<compile_context>
chip_gen: v5e
topology: v5e:2x2
jax: 0.10.0
libtpu: 0.0.40
codegen_flags: <defaults>
</compile_context>

<pallas_src>
import jax
import jax.numpy as jnp
from jax.experimental import pallas as pl
from jax.experimental.pallas import tpu as pltpu

HIDDEN = 64        # module's hidden width
HIDDEN_PAD = 128   # padded hidden width = native lane width
TILE_QUANT = 512   # batch-tile quantum (multiple of the 16/8 sublane constraints)


def _round_up(x, m):
    return ((x + m - 1) // m) * m


def qnet_kernel(x_ref, w1_ref, b1_ref, w2_ref, b2_ref, w3_ref, b3_ref, out_ref):
    # x arrives f32; cast to bf16 right before the MXU.  All matmuls accumulate
    # in f32 (preferred_element_type); bias-add / ReLU stay f32.
    x = x_ref[...].astype(jnp.bfloat16)                               # (T, IN)
    h1 = jnp.dot(x, w1_ref[...], preferred_element_type=jnp.float32) + b1_ref[...]
    h1 = jnp.maximum(h1, 0.0)                                         # (T, 128) f32
    h2 = jnp.dot(h1.astype(jnp.bfloat16), w2_ref[...],
                 preferred_element_type=jnp.float32) + b2_ref[...]
    h2 = jnp.maximum(h2, 0.0)                                         # (T, 128) f32
    out = jnp.dot(h2.astype(jnp.bfloat16), w3_ref[...],
                  preferred_element_type=jnp.float32) + b3_ref[...]   # (T, NPAD) f32
    out_ref[...] = out.astype(out_ref.dtype)                          # bf16 writeback


def prepare_params(params):
    """One-time parameter prep (do this once per optimizer step, not per forward):
    cast weights to bf16 and zero-pad hidden 64->128 and output columns to a
    multiple of 128.  Padded rows/cols are exact zeros -> results unchanged."""
    w1, b1 = params["w1"], params["b1"]
    w2, b2 = params["w2"], params["b2"]
    w3, b3 = params["w3"], params["b3"]
    hidden = w1.shape[1]
    out_dim = w3.shape[1]
    hpad = HIDDEN_PAD
    npad = _round_up(max(out_dim, 128), 128)
    return {
        "w1": jnp.pad(w1, ((0, 0), (0, hpad - hidden))).astype(jnp.bfloat16),
        "b1": jnp.pad(b1, ((0, 0), (0, hpad - hidden))).astype(jnp.float32),
        "w2": jnp.pad(w2, ((0, hpad - hidden), (0, hpad - hidden))).astype(jnp.bfloat16),
        "b2": jnp.pad(b2, ((0, 0), (0, hpad - hidden))).astype(jnp.float32),
        "w3": jnp.pad(w3, ((0, hpad - hidden), (0, npad - out_dim))).astype(jnp.bfloat16),
        "b3": jnp.pad(b3, ((0, 0), (0, npad - out_dim))).astype(jnp.float32),
        "out_dim": out_dim,
        "n_pad": npad,
    }


def qnetwork_forward(x, prep, *, tile_b=2048):
    """x: (B, input_dim) float32.  prep: output of prepare_params."""
    B, in_dim = x.shape
    out_dim, n_pad = prep["out_dim"], prep["n_pad"]
    w1, b1 = prep["w1"], prep["b1"]
    w2, b2 = prep["w2"], prep["b2"]
    w3, b3 = prep["w3"], prep["b3"]
    assert w1.shape[0] == in_dim, "x feature dim does not match prepared params"

    # Batch tiling:
    #  * tile is always a multiple of 16 (legal (16,128) bf16 out block and
    #    (8,*) f32 x block at lowering).
    #  * small batches: one tile, minimal padding.
    #  * large batches: 512-row quantum, capped at tile_b, and capped at half
    #    the batch so there are >=2 tiles -> the "parallel" axis shards across
    #    both v7x TensorCores (no-op on single-TC v5e/v6e).
    b16 = _round_up(B, 16)
    if b16 <= TILE_QUANT:
        tile = b16
    else:
        half = _round_up(-(-b16 // 2), TILE_QUANT)
        tile = max(TILE_QUANT, min(_round_up(tile_b, TILE_QUANT), half))
    b_pad = _round_up(B, tile)
    grid = (b_pad // tile,)

    x_p = x if b_pad == B else jnp.pad(x, ((0, b_pad - B), (0, 0)))

    vmem = pltpu.MemorySpace.VMEM

    def resident(shape):
        # Full-array block, constant block index -> fetched once, stays
        # VMEM-resident across all grid steps (Pallas skips the re-DMA).
        return pl.BlockSpec(shape, lambda i: (0, 0), memory_space=vmem)

    flops = 2 * b_pad * (in_dim * HIDDEN_PAD + HIDDEN_PAD * HIDDEN_PAD + HIDDEN_PAD * n_pad)
    bytes_accessed = (
        x_p.size * 4                                   # f32 x stream
        + (w1.size + w2.size + w3.size) * 2            # bf16 resident weights
        + (b1.size + b2.size + b3.size) * 4            # f32 biases
        + b_pad * n_pad * 2                            # bf16 output slab writeback
    )

    out = pl.pallas_call(
        qnet_kernel,
        out_shape=jax.ShapeDtypeStruct((b_pad, n_pad), jnp.bfloat16),
        grid=grid,
        in_specs=[
            pl.BlockSpec((tile, in_dim), lambda i: (i, 0), memory_space=vmem),
            resident(w1.shape),
            resident(b1.shape),
            resident(w2.shape),
            resident(b2.shape),
            resident(w3.shape),
            resident(b3.shape),
        ],
        out_specs=pl.BlockSpec((tile, n_pad), lambda i: (i, 0), memory_space=vmem),
        compiler_params=pltpu.CompilerParams(
            dimension_semantics=("parallel",),   # shards batch tiles across TCs on v7x
        ),
        cost_estimate=pl.CostEstimate(
            flops=flops, transcendentals=0, bytes_accessed=bytes_accessed
        ),
    )(x_p, w1, b1, w2, b2, w3, b3)

    # Slice off batch/output padding; return f32 like the PyTorch module.
    # (For a Q-learning consumer, fusing the argmax / action-gather into the
    #  kernel would remove this read-back entirely.)
    return out[:B, :out_dim].astype(jnp.float32)


def init_params(key, input_dim, output_dim, hidden=64):
    """Deterministic PyTorch-style (Kaiming-uniform) init for the 3 Linear layers."""
    def linear(k, fan_in, fan_out):
        kw, kb = jax.random.split(k)
        bound = 1.0 / jnp.sqrt(fan_in)
        w = jax.random.uniform(kw, (fan_in, fan_out), jnp.float32, -bound, bound)
        b = jax.random.uniform(kb, (1, fan_out), jnp.float32, -bound, bound)
        return w, b

    k1, k2, k3 = jax.random.split(key, 3)
    w1, b1 = linear(k1, input_dim, hidden)
    w2, b2 = linear(k2, hidden, hidden)
    w3, b3 = linear(k3, hidden, output_dim)
    return {"w1": w1, "b1": b1, "w2": w2, "b2": b2, "w3": w3, "b3": b3}


def qnetwork_ref(x, p):
    """Pure-JAX f32 reference matching the PyTorch forward."""
    h1 = jnp.maximum(x @ p["w1"] + p["b1"], 0.0)
    h2 = jnp.maximum(h1 @ p["w2"] + p["b2"], 0.0)
    return h2 @ p["w3"] + p["b3"]


def qnetwork_ref_bf16(x, p):
    """Reference with the same bf16-operand / f32-accumulate / bf16-output
    numerics as the kernel (unpadded hidden -> mathematically identical)."""
    xb = x.astype(jnp.bfloat16)
    w1 = p["w1"].astype(jnp.bfloat16)
    w2 = p["w2"].astype(jnp.bfloat16)
    w3 = p["w3"].astype(jnp.bfloat16)
    h1 = jnp.maximum(jnp.dot(xb, w1, preferred_element_type=jnp.float32) + p["b1"], 0.0)
    h2 = jnp.maximum(
        jnp.dot(h1.astype(jnp.bfloat16), w2, preferred_element_type=jnp.float32) + p["b2"], 0.0)
    out = jnp.dot(h2.astype(jnp.bfloat16), w3, preferred_element_type=jnp.float32) + p["b3"]
    return out.astype(jnp.bfloat16).astype(jnp.float32)


if __name__ == "__main__":
    key = jax.random.PRNGKey(0)
    k_params, k_x = jax.random.split(key)

    # Small, module-consistent shapes: flat observation vector -> Q-values over
    # a few discrete actions; ragged replay-style batch exercises the batch
    # padding and the >=2-tile (v7x megacore) path.
    batch = 1000
    input_dim = 8
    output_dim = 4

    params = init_params(k_params, input_dim, output_dim, hidden=HIDDEN)
    prep = prepare_params(params)   # one-time bf16 cast + hidden/output padding
    x = jax.random.normal(k_x, (batch, input_dim), jnp.float32)

    out = qnetwork_forward(x, prep, tile_b=2048)
    out = jax.block_until_ready(out)

    assert out.shape == (batch, output_dim)

    ref_bf16 = qnetwork_ref_bf16(x, params)   # same quantization as the kernel
    ref_f32 = qnetwork_ref(x, params)         # full-precision PyTorch-equivalent
    assert jnp.allclose(out, ref_bf16, atol=1e-2, rtol=1e-2), \
        "Pallas output mismatch vs bf16-matched reference"
    assert jnp.allclose(out, ref_f32, atol=5e-2, rtol=5e-2), \
        "Pallas output mismatch vs f32 reference (beyond bf16 quantization error)"

    print("KERNEL_OK")
</pallas_src>

<mosaic_0001>
module attributes {stable_mosaic.version = 11 : i64} {
  func.func @qnet_kernel(%arg0: i32, %arg1: memref<512x8xf32, #tpu.memory_space<vmem>>, %arg2: memref<8x128xbf16, #tpu.memory_space<vmem>>, %arg3: memref<1x128xf32, #tpu.memory_space<vmem>>, %arg4: memref<128x128xbf16, #tpu.memory_space<vmem>>, %arg5: memref<1x128xf32, #tpu.memory_space<vmem>>, %arg6: memref<128x128xbf16, #tpu.memory_space<vmem>>, %arg7: memref<1x128xf32, #tpu.memory_space<vmem>>, %arg8: memref<512x128xbf16, #tpu.memory_space<vmem>>) attributes {dimension_semantics = [#tpu.dimension_semantics<parallel>], iteration_bounds = array<i64: 2>, scalar_prefetch = 0 : i64, scratch_operands = 0 : i64, tpu.core_type = #tpu.core_type<tc>, window_params = [{transform_indices = @transform_0, window_bounds = array<i64: 512, 8>}, {pipeline_mode = #tpu.pipeline_mode<synchronous>, transform_indices = @transform_1, window_bounds = array<i64: 8, 128>}, {pipeline_mode = #tpu.pipeline_mode<synchronous>, transform_indices = @transform_2, window_bounds = array<i64: 1, 128>}, {pipeline_mode = #tpu.pipeline_mode<synchronous>, transform_indices = @transform_3, window_bounds = array<i64: 128, 128>}, {pipeline_mode = #tpu.pipeline_mode<synchronous>, transform_indices = @transform_4, window_bounds = array<i64: 1, 128>}, {pipeline_mode = #tpu.pipeline_mode<synchronous>, transform_indices = @transform_5, window_bounds = array<i64: 128, 128>}, {pipeline_mode = #tpu.pipeline_mode<synchronous>, transform_indices = @transform_6, window_bounds = array<i64: 1, 128>}, {transform_indices = @transform_7, window_bounds = array<i64: 512, 128>}]} {
    %c0 = arith.constant 0 : index
    %c0_0 = arith.constant 0 : index
    %0 = vector.load %arg1[%c0, %c0_0] : memref<512x8xf32, #tpu.memory_space<vmem>>, vector<512x8xf32>
    %1 = arith.truncf %0 : vector<512x8xf32> to vector<512x8xbf16>
    %c0_1 = arith.constant 0 : index
    %c0_2 = arith.constant 0 : index
    %2 = vector.load %arg2[%c0_1, %c0_2] : memref<8x128xbf16, #tpu.memory_space<vmem>>, vector<8x128xbf16>
    %cst = arith.constant dense<0.000000e+00> : vector<512x128xf32>
    %3 = tpu.matmul %1, %2, %cst {dimension_numbers = #tpu.dot_dimension_numbers<[1], [0], [0], [1], [0, 0, 1, 1], [], []>} : vector<512x8xbf16>, vector<8x128xbf16>, vector<512x128xf32> -> vector<512x128xf32>
    %c0_3 = arith.constant 0 : index
    %c0_4 = arith.constant 0 : index
    %4 = vector.load %arg3[%c0_3, %c0_4] : memref<1x128xf32, #tpu.memory_space<vmem>>, vector<1x128xf32>
    %5 = vector.broadcast %4 : vector<1x128xf32> to vector<512x128xf32>
    %6 = arith.addf %3, %5 : vector<512x128xf32>
    %cst_5 = arith.constant 0.000000e+00 : f32
    %7 = vector.broadcast %cst_5 : f32 to vector<512x128xf32>
    %8 = arith.maximumf %6, %7 : vector<512x128xf32>
    %9 = arith.truncf %8 : vector<512x128xf32> to vector<512x128xbf16>
    %c0_6 = arith.constant 0 : index
    %c0_7 = arith.constant 0 : index
    %10 = vector.load %arg4[%c0_6, %c0_7] : memref<128x128xbf16, #tpu.memory_space<vmem>>, vector<128x128xbf16>
    %cst_8 = arith.constant dense<0.000000e+00> : vector<512x128xf32>
    %11 = tpu.matmul %9, %10, %cst_8 {dimension_numbers = #tpu.dot_dimension_numbers<[1], [0], [0], [1], [0, 0, 1, 1], [], []>} : vector<512x128xbf16>, vector<128x128xbf16>, vector<512x128xf32> -> vector<512x128xf32>
    %c0_9 = arith.constant 0 : index
    %c0_10 = arith.constant 0 : index
    %12 = vector.load %arg5[%c0_9, %c0_10] : memref<1x128xf32, #tpu.memory_space<vmem>>, vector<1x128xf32>
    %13 = vector.broadcast %12 : vector<1x128xf32> to vector<512x128xf32>
    %14 = arith.addf %11, %13 : vector<512x128xf32>
    %cst_11 = arith.constant 0.000000e+00 : f32
    %15 = vector.broadcast %cst_11 : f32 to vector<512x128xf32>
    %16 = arith.maximumf %14, %15 : vector<512x128xf32>
    %17 = arith.truncf %16 : vector<512x128xf32> to vector<512x128xbf16>
    %c0_12 = arith.constant 0 : index
    %c0_13 = arith.constant 0 : index
    %18 = vector.load %arg6[%c0_12, %c0_13] : memref<128x128xbf16, #tpu.memory_space<vmem>>, vector<128x128xbf16>
    %cst_14 = arith.constant dense<0.000000e+00> : vector<512x128xf32>
    %19 = tpu.matmul %17, %18, %cst_14 {dimension_numbers = #tpu.dot_dimension_numbers<[1], [0], [0], [1], [0, 0, 1, 1], [], []>} : vector<512x128xbf16>, vector<128x128xbf16>, vector<512x128xf32> -> vector<512x128xf32>
    %c0_15 = arith.constant 0 : index
    %c0_16 = arith.constant 0 : index
    %20 = vector.load %arg7[%c0_15, %c0_16] : memref<1x128xf32, #tpu.memory_space<vmem>>, vector<1x128xf32>
    %21 = vector.broadcast %20 : vector<1x128xf32> to vector<512x128xf32>
    %22 = arith.addf %19, %21 : vector<512x128xf32>
    %23 = arith.truncf %22 : vector<512x128xf32> to vector<512x128xbf16>
    %c0_17 = arith.constant 0 : index
    %c0_18 = arith.constant 0 : index
    %24 = vector.load %arg8[%c0_17, %c0_18] : memref<512x128xbf16, #tpu.memory_space<vmem>>, vector<512x128xbf16>
    tpu.vector_store %arg8[%c0_17, %c0_18], %23 {strides = array<i32>} : memref<512x128xbf16, #tpu.memory_space<vmem>>, vector<512x128xbf16>,
    return
  }
  func.func @transform_0(%arg0: i32) -> (i32, i32) {
    %c0_i32 = arith.constant 0 : i32
    %c0_i32_0 = arith.constant 0 : i32
    return %arg0, %c0_i32 : i32, i32
  }
  func.func @transform_1(%arg0: i32) -> (i32, i32) {
    %c0_i32 = arith.constant 0 : i32
    %c0_i32_0 = arith.constant 0 : i32
    %c0_i32_1 = arith.constant 0 : i32
    return %c0_i32, %c0_i32_0 : i32, i32
  }
  func.func @transform_2(%arg0: i32) -> (i32, i32) {
    %c0_i32 = arith.constant 0 : i32
    %c0_i32_0 = arith.constant 0 : i32
    %c0_i32_1 = arith.constant 0 : i32
    return %c0_i32, %c0_i32_0 : i32, i32
  }
  func.func @transform_3(%arg0: i32) -> (i32, i32) {
    %c0_i32 = arith.constant 0 : i32
    %c0_i32_0 = arith.constant 0 : i32
    %c0_i32_1 = arith.constant 0 : i32
    return %c0_i32, %c0_i32_0 : i32, i32
  }
  func.func @transform_4(%arg0: i32) -> (i32, i32) {
    %c0_i32 = arith.constant 0 : i32
    %c0_i32_0 = arith.constant 0 : i32
    %c0_i32_1 = arith.constant 0 : i32
    return %c0_i32, %c0_i32_0 : i32, i32
  }
  func.func @transform_5(%arg0: i32) -> (i32, i32) {
    %c0_i32 = arith.constant 0 : i32
    %c0_i32_0 = arith.constant 0 : i32
    %c0_i32_1 = arith.constant 0 : i32
    return %c0_i32, %c0_i32_0 : i32, i32
  }
  func.func @transform_6(%arg0: i32) -> (i32, i32) {
    %c0_i32 = arith.constant 0 : i32
    %c0_i32_0 = arith.constant 0 : i32
    %c0_i32_1 = arith.constant 0 : i32
    return %c0_i32, %c0_i32_0 : i32, i32
  }
  func.func @transform_7(%arg0: i32) -> (i32, i32) {
    %c0_i32 = arith.constant 0 : i32
    %c0_i32_0 = arith.constant 0 : i32
    return %arg0, %c0_i32 : i32, i32
  }
}

</mosaic_0001>

<bundles_post_ra>
// kernel: tpu_custom_call.1
= control target key start
LH: loop header
LB: loop body
LE: loop exit
PB: predicated region body
PF: predicated region fallthrough
CT: control target
= control target key end

     0   :  { %12 = vsyncpa [#allocation3], 0  ;;  %s2530_s0 = inlined_call_operand.vmem [shape: f32[1024,8], index: 0, kind: input, shape index: {}]   ;;  %s2531_s1 = inlined_call_operand.vmem [shape: bf16[8,128], index: 1, kind: input, shape index: {}]   ;;  %s2532_s2 = inlined_call_operand.vmem [shape: f32[1,128], index: 2, kind: input, shape index: {}]   ;;  %s2533_s3 = inlined_call_operand.vmem [shape: bf16[128,128], index: 3, kind: input, shape index: {}]   ;;  %s2534_s4 = inlined_call_operand.vmem [shape: f32[1,128], index: 4, kind: input, shape index: {}]   ;;  %s2535_s5 = inlined_call_operand.vmem [shape: bf16[128,128], index: 5, kind: input, shape index: {}]   ;;  %s2536_s6 = inlined_call_operand.vmem [shape: f32[1,128], index: 6, kind: input, shape index: {}]   ;;  %s2537_s7 = inlined_call_operand.hbm [shape: bf16[1024,128], index: 7, kind: output, shape index: {}]  }
   0x1   :  { %14 = vsyncpa [#allocation3 + $0x1], 0  ;;  %s2009_s24 = smov 0   ;;  %s2011_s25 = smov 0  }
   0x2   :  { %s2013_s26 = smov 0   ;;  %s2015_s27 = smov 0  }
   0x3 LB: > { %s2030_s28 = sadd.s32 4294967295, %s1965_s27   ;;  %s1524_s29 = sadd.s32 4294967294, %s1965_s27   ;;  %s1965_s27 = sphi %s2015_s27, %s2543_s27   ;;  %s1961_s26 = sphi %s2013_s26, %s2542_s26   ;;  %s1957_s25 = sphi %s2011_s25, %s2541_s25   ;;  %s1953_s24 = sphi %s2009_s24, %s2540_s24  }
   0x4   : > { %s2034_s30 = sadd.s32 1, %s1965_s27   ;;  %s179_s8 = sadd.s32 1, %s1961_s26 }
   0x5   : > { %s176_s9 = ssub.s32 %s1965_s27, %s2034_s30  ;;  %p189_p0 = scmp.ne.s32.totalorder %s1961_s26, %s1957_s25 }
   0x6   : > { %p177_p1 = scmp.eq.s32.totalorder %s176_s9, 0  ;;  %p190_p2 = scmp.eq.s32.totalorder %s2030_s28, 1 }
   0x7   : > { %p195_p3 = scmp.ne.s32.totalorder %s1957_s25, %s1953_s24  ;;  %p196_p4 = scmp.eq.s32.totalorder %s1524_s29, 1 }
   0x8   : > { %s2045_s10 = scalar_select %p177_p1, %s1961_s26, %s179_s8  }
   0x9   : > { %p2047_p5 = por %p190_p2, %p189_p0  ;;  %p2051_p6 = por %p196_p4, %p195_p3 }
   0xa   : > { %p1527_p7 = scmp.ge.s32.totalorder %s1965_s27, 1  ;;  %p241_p8 = scmp.lt.s32.totalorder %s1965_s27, 3 }
   0xc   : > { %p242_p9 = pnand %p1527_p7, %p241_p8 }
   0xd   : > { %s1529_s15 = sshll.u32 (!%p242_p9), %s2030_s28, 6  ;;  %s1648_s8 = sshll.u32 (!%p242_p9), %s2030_s28, 8 }
   0xe   : > { %245 = sbr.rel (%p242_p9) target bundleno = 955 (0x3bb), region = 48  ;;  %p274_p10 = scmp.lt.s32.totalorder (!%p242_p9), %s1529_s15, 127 }
   0xf   : > { %s1458_s14 = scalar_lea.hbm (!%p242_p9), %s2537_s7, %s1648_s8  ;;  %s1923_s23 = scalar_lea.hbm (!%p242_p9), %s2537_s7, 512 }
  0x10   : > { %s1461_s17 = sshll.u32 (!%p242_p9), %s1458_s14, 4  ;;  %s1462_s17 = int_to_ptr.hbm [resolvable:$true] %s1461_s17 }
  0x13   : > { %v377_v0 = vld [vmem:[%s2531_s1] sm:$0xf]  ;;  %vm479_vm0 = vcmask 1043456   ;;  %s2545_s15 = smov (!%p274_p10, %s1529_s15), 127  ;;  %vm382_vm1 = vcmask 64512   ;;  %v1639_v17 = vld [vmem:[%s2533_s3 + $0x38] sm:$0xff] }
  0x14   : > { %v481_v1 = vsel %vm479_vm0, %v377_v0, 0  ;;  %s1530_s16 = sshll.u32 %s2545_s15, 3  ;;  %816 = vmatpush.bf16.msra.mxu1 %v1639_v17  ;;  %v1638_v21 = vld [vmem:[%s2533_s3 + $0x30] sm:$0xff]  ;;  %v1637_v22 = vld [vmem:[%s2533_s3 + $0x28] sm:$0xff]  ;;  %v1636_v23 = vld [vmem:[%s2533_s3 + $0x20] sm:$0xff] }
  0x15   : > { %490 = vmatpush.bf16.msra.mxu0 %v481_v1  ;;  %1840 = vmatpush.bf16.msra.mxu3 %v481_v1  ;;  %s2064_s19 = scalar_lea.vmem %s2530_s0, %s1530_s16  ;;  %v1635_v26 = vld [vmem:[%s2533_s3 + $0x18] sm:$0xff]  ;;  %v1634_v28 = vld [vmem:[%s2533_s3 + $0x10] sm:$0xff]  ;;  %v1633_v29 = vld [vmem:[%s2533_s3 + $0x8] sm:$0xff]  ;;  %s270_s16 = sand.u32 1, %s1957_s25  }
  0x16   : > { %v281_v2 = vld [vmem:[%s2064_s19] sm:$0xff]  ;;  %v282_v3 = vld [vmem:[%s2064_s19 + $0x8] sm:$0xff]  ;;  %v283_v5 = vld [vmem:[%s2064_s19 + $0x10] sm:$0xff]  ;;  %s1528_s20 = sshll.u32 %s270_s16, 8  ;;  %s1447_s18 = scalar_lea.sflag [#allocation3], %s270_s16 }
  0x17   : > { %v345_v4 = vpack.c.bf16 %v282_v3, %v281_v2  ;;  %v284_v6 = vld [vmem:[%s2064_s19 + $0x18] sm:$0xff]  ;;  %v285_v8 = vld [vmem:[%s2064_s19 + $0x20] sm:$0xff]  ;;  %v286_v9 = vld [vmem:[%s2064_s19 + $0x28] sm:$0xff]  ;;  %s2314_s21 = scalar_lea.vmem [#allocation2], %s1528_s20  ;;  %s1917_s20 = sshra.s32 %s1462_s17, 4  ;;  %s1918_s20 = int_to_ptr.hbm [resolvable:$true] %s1917_s20 }
  0x18   : > { %v346_v7 = vpack.c.bf16 %v284_v6, %v283_v5  ;;  %v347_v10 = vpack.c.bf16 %v286_v9, %v285_v8  ;;  %v287_v11 = vld [vmem:[%s2064_s19 + $0x30] sm:$0xff]  ;;  %v288_v12 = vld [vmem:[%s2064_s19 + $0x38] sm:$0xff]  ;;  %v289_v14 = vld [vmem:[%s2064_s19 + $0x40] sm:$0xff]  ;;  %817 = vmatpush.bf16.msra.mxu1 %v1638_v21  ;;  %s1459_s15 = sshll.u32 %s2314_s21, 4  ;;  %s1919_s28 = scalar_lea.hbm %s1918_s20, 256  ;;  %s1460_s15 = int_to_ptr.vmem [resolvable:$true] %s1459_s15 }
  0x19   : > { %1531 = vmatmul.msk.bf16.vlgmr.msra.gmra.mxu0 %vm382_vm1, %v345_v4  ;;  %v348_v13 = vpack.c.bf16 %v288_v12, %v287_v11  ;;  %v290_v15 = vld [vmem:[%s2064_s19 + $0x48] sm:$0xff]  ;;  %1841 = vmatpush.bf16.msrb.mxu3 %v1639_v17  ;;  %v291_v18 = vld [vmem:[%s2064_s19 + $0x50] sm:$0xff]  ;;  %v292_v19 = vld [vmem:[%s2064_s19 + $0x58] sm:$0xff]  ;;  %p1920_p11 = scmp.ne.s32.totalorder %s1918_s20, %s1919_s28  ;;  %p1924_p0 = scmp.lt.s32.totalorder %s1918_s20, %s2537_s7 }
  0x1a   : > { %v349_v16 = vpack.c.bf16 %v290_v15, %v289_v14  ;;  %v350_v20 = vpack.c.bf16 %v292_v19, %v291_v18  ;;  %v293_v24 = vld [vmem:[%s2064_s19 + $0x60] sm:$0xff]  ;;  %v294_v25 = vld [vmem:[%s2064_s19 + $0x68] sm:$0xff]  ;;  %v295_v31 = vld [vmem:[%s2064_s19 + $0x70] sm:$0xff]  ;;  %p1925_p1 = scmp.lt.s32.totalorder %s1923_s23, %s1919_s28 }
  0x1b   : > { %v351_v27 = vpack.c.bf16 %v294_v25, %v293_v24  ;;  %v1632_v30 = vld [vmem:[%s2533_s3] sm:$0xff]  ;;  %v296_v32 = vld [vmem:[%s2064_s19 + $0x78] sm:$0xff]  ;;  %v298_v35 = vld [vmem:[%s2064_s19 + $0x88] sm:$0xff]  ;;  %p1921_p12 = pnand %p1920_p11, %p2047_p5 }
  0x1c   : > { %818 = vmatpush.bf16.msra.mxu1 %v1637_v22  ;;  %v352_v33 = vpack.c.bf16 %v296_v32, %v295_v31  ;;  %v297_v34 = vld [vmem:[%s2064_s19 + $0x80] sm:$0xff]  ;;  %v299_v44 = vld [vmem:[%s2064_s19 + $0x90] sm:$0xff]  ;;  %v300_v45 = vld [vmem:[%s2064_s19 + $0x98] sm:$0xff]  ;;  %p1926_p2 = por %p1925_p1, %p1924_p0 }
  0x1d   : > { %1842 = vmatpush.bf16.msrb.mxu3 %v1638_v21  ;;  %v353_v36 = vpack.c.bf16 %v298_v35, %v297_v34  ;;  %v2119_v38 = vld [vmem:[%s2532_s2] ss:$0 sm:$0xff]  ;;  %v354_v47 = vpack.c.bf16 %v300_v45, %v299_v44  ;;  %v302_v55 = vld [vmem:[%s2064_s19 + $0xa8] sm:$0xff]  ;;  %v303_v0 = vld [vmem:[%s2064_s19 + $0xb0] sm:$0xff]  ;;  %p1922_p13 = pneg %p1921_p12 }
  0x1e   : > { %v301_v54 = vld [vmem:[%s2064_s19 + $0xa0] sm:$0xff]  ;;  %v304_v1 = vld [vmem:[%s2064_s19 + $0xb8] sm:$0xff]  ;;  %v306_v11 = vld [vmem:[%s2064_s19 + $0xc8] sm:$0xff] }
  0x1f   : > { %v355_v57 = vpack.c.bf16 %v302_v55, %v301_v54  ;;  %v356_v3 = vpack.c.bf16 %v304_v1, %v303_v0  ;;  %v308_v21 = vld [vmem:[%s2064_s19 + $0xd8] sm:$0xff]  ;;  %v309_v31 = vld [vmem:[%s2064_s19 + $0xe0] sm:$0xff]  ;;  %v310_v32 = vld [vmem:[%s2064_s19 + $0xe8] sm:$0xff]  ;;  %p1927_p3 = pnand %p1926_p2, %p1922_p13 }
  0x20   : > { %819 = vmatpush.bf16.msra.mxu1 %v1636_v23  ;;  %v2160_v34 = vld [vmem:[%s2535_s5 + $0x30] sm:$0xff]  ;;  %v359_v35 = vpack.c.bf16 %v310_v32, %v309_v31 }
  0x21   : > { %1843 = vmatpush.bf16.msrb.mxu3 %v1637_v22 }
  0x24   : > { %820 = vmatpush.bf16.msra.mxu1 %v1635_v26 }
  0x25   : > { %1844 = vmatpush.bf16.msrb.mxu3 %v1636_v23 }
  0x28   : > { %821 = vmatpush.bf16.msra.mxu1 %v1634_v28 }
  0x29   : > { %1532 = vmatmul.msk.bf16.gmra.mxu0 %vm382_vm1, %v346_v7  ;;  %1845 = vmatpush.bf16.msrb.mxu3 %v1635_v26 }
  0x2c   : > { %822 = vmatpush.bf16.msra.mxu1 %v1633_v29 }
  0x2d   : > { %1846 = vmatpush.bf16.msrb.mxu3 %v1634_v28  ;;  %v2152_v28 = vld [vmem:[%s2535_s5 + $0x38] sm:$0xff] }
  0x2e   : > { %1149 = vmatpush.bf16.msra.mxu2 %v2152_v28 }
  0x30   : > { %823 = vmatpush.bf16.msra.mxu1 %v1632_v30 }
  0x31   : > { %1847 = vmatpush.bf16.msrb.mxu3 %v1633_v29 }
  0x32   : > { %1150 = vmatpush.bf16.msra.mxu2 %v2160_v34 }
  0x35   : > { %1848 = vmatpush.bf16.msrb.mxu3 %v1632_v30 }
  0x39   : > { %1533 = vmatmul.msk.bf16.gmra.mxu0 %vm382_vm1, %v347_v10  ;;  %v305_v10 = vld [vmem:[%s2064_s19 + $0xc0] sm:$0xff] }
  0x49   : > { %1534 = vmatmul.msk.bf16.gmra.mxu0 %vm382_vm1, %v348_v13  ;;  %v357_v13 = vpack.c.bf16 %v306_v11, %v305_v10 }
  0x59   : > { %1535 = vmatmul.msk.bf16.gmra.mxu0 %vm382_vm1, %v349_v16 }
  0x69   : > { %1536 = vmatmul.msk.bf16.gmra.mxu0 %vm382_vm1, %v350_v20  ;;  %v307_v20 = vld [vmem:[%s2064_s19 + $0xd0] sm:$0xff] }
  0x6a   : > { %v358_v23 = vpack.c.bf16 %v308_v21, %v307_v20 }
  0x79   : > { %1537 = vmatmul.msk.bf16.gmra.mxu0 %vm382_vm1, %v351_v27 }
  0x89   : > { %1538 = vmatmul.msk.bf16.gmra.mxu0 %vm382_vm1, %v352_v33 }
  0x96   : > { %v492_v37 = vpop.f32.mrf.mxu0 }
  0x97   : > { %v493_v39 = vadd.f32 %v2119_v38, %v492_v37  ;;  %v2166_v37 = vld [vmem:[%s2535_s5 + $0x28] sm:$0xff] }
  0x98   : > { %1151 = vmatpush.bf16.msra.mxu2 %v2166_v37 }
  0x99   : > { %1539 = vmatmul.msk.bf16.gmra.mxu0 %vm382_vm1, %v353_v36  ;;  %v652_v42 = vmax.f32 %v493_v39, 0.0  ;;  %v2173_v39 = vld [vmem:[%s2535_s5 + $0x20] sm:$0xff] }
  0x9c   : > { %1152 = vmatpush.bf16.msra.mxu2 %v2173_v39 }
  0x9e   : > { %v494_v40 = vpop.f32.mrf.mxu0 }
  0x9f   : > { %v495_v41 = vadd.f32 %v2119_v38, %v494_v40 }
  0xa1   : > { %v653_v43 = vmax.f32 %v495_v41, 0.0 }
  0xa3   : > { %v716_v46 = vpack.c.bf16 %v653_v43, %v652_v42  ;;  %v2181_v43 = vld [vmem:[%s2535_s5 + $0x18] sm:$0xff] }
  0xa4   : > { %1153 = vmatpush.bf16.msra.mxu2 %v2181_v43 }
  0xa5   : > { %824 = vmatmul.bf16.vlgmr.msra.gmra.mxu1 %v716_v46  ;;  %v311_v46 = vld [vmem:[%s2064_s19 + $0xf0] sm:$0xff] }
  0xa6   : > { %v497_v48 = vpop.f32.mrf.mxu0 }
  0xa7   : > { %v498_v49 = vadd.f32 %v2119_v38, %v497_v48 }
  0xa9   : > { %1540 = vmatmul.msk.bf16.gmra.mxu0 %vm382_vm1, %v354_v47  ;;  %v654_v52 = vmax.f32 %v498_v49, 0.0  ;;  %v312_v47 = vld [vmem:[%s2064_s19 + $0xf8] sm:$0xff]  ;;  %v2189_v49 = vld [vmem:[%s2535_s5 + $0x10] sm:$0xff] }
  0xaa   : > { %1154 = vmatpush.bf16.msra.mxu2 %v2189_v49 }
  0xae   : > { %v499_v50 = vpop.f32.mrf.mxu0 }
  0xaf   : > { %v500_v51 = vadd.f32 %v2119_v38, %v499_v50  ;;  %v360_v50 = vpack.c.bf16 %v312_v47, %v311_v46  ;;  %v319_v47 = vld [vmem:[%s2064_s19 + $0x130] sm:$0xff] }
  0xb1   : > { %v655_v53 = vmax.f32 %v500_v51, 0.0 }
  0xb3   : > { %v717_v56 = vpack.c.bf16 %v655_v53, %v654_v52  ;;  %v2195_v52 = vld [vmem:[%s2535_s5 + $0x8] sm:$0xff]  ;;  %v2202_v53 = vld [vmem:[%s2535_s5] sm:$0xff] }
  0xb4   : > { %1155 = vmatpush.bf16.msra.mxu2 %v2195_v52 }
  0xb5   : > { %829 = vmatmul.bf16.gmra.mxu1 %v717_v56 }
  0xb6   : > { %v502_v58 = vpop.f32.mrf.mxu0 }
  0xb7   : > { %v503_v59 = vadd.f32 %v2119_v38, %v502_v58 }
  0xb8   : > { %1156 = vmatpush.bf16.msra.mxu2 %v2202_v53 }
  0xb9   : > { %1541 = vmatmul.msk.bf16.gmra.mxu0 %vm382_vm1, %v355_v57  ;;  %v656_v62 = vmax.f32 %v503_v59, 0.0  ;;  %v313_v59 = vld [vmem:[%s2064_s19 + $0x100] sm:$0xff] }
  0xbe   : > { %v504_v60 = vpop.f32.mrf.mxu0 }
  0xbf   : > { %v505_v61 = vadd.f32 %v2119_v38, %v504_v60  ;;  %v314_v60 = vld [vmem:[%s2064_s19 + $0x108] sm:$0xff] }
  0xc1   : > { %v657_v63 = vmax.f32 %v505_v61, 0.0 }
  0xc3   : > { %v718_v2 = vpack.c.bf16 %v657_v63, %v656_v62  ;;  %v361_v62 = vpack.c.bf16 %v314_v60, %v313_v59 }
  0xc5   : > { %834 = vmatmul.bf16.gmra.mxu1 %v718_v2 }
  0xc6   : > { %v507_v4 = vpop.f32.mrf.mxu0 }
  0xc7   : > { %v508_v5 = vadd.f32 %v2119_v38, %v507_v4 }
  0xc9   : > { %1542 = vmatmul.msk.bf16.gmra.mxu0 %vm382_vm1, %v356_v3  ;;  %v658_v8 = vmax.f32 %v508_v5, 0.0 }
  0xce   : > { %v509_v6 = vpop.f32.mrf.mxu0 }
  0xcf   : > { %v510_v7 = vadd.f32 %v2119_v38, %v509_v6  ;;  %v315_v6 = vld [vmem:[%s2064_s19 + $0x110] sm:$0xff] }
  0xd1   : > { %v659_v9 = vmax.f32 %v510_v7, 0.0  ;;  %v316_v7 = vld [vmem:[%s2064_s19 + $0x118] sm:$0xff] }
  0xd2   : > { %v362_v10 = vpack.c.bf16 %v316_v7, %v315_v6 }
  0xd3   : > { %v719_v12 = vpack.c.bf16 %v659_v9, %v658_v8  ;;  %v2217_v9 = vld [vmem:[%s2534_s4] ss:$0 sm:$0xff] }
  0xd5   : > { %839 = vmatmul.bf16.gmra.mxu1 %v719_v12 }
  0xd6   : > { %v512_v14 = vpop.f32.mrf.mxu0 }
  0xd7   : > { %v513_v15 = vadd.f32 %v2119_v38, %v512_v14 }
  0xd9   : > { %1543 = vmatmul.msk.bf16.gmra.mxu0 %vm382_vm1, %v357_v13  ;;  %v660_v18 = vmax.f32 %v513_v15, 0.0 }
  0xde   : > { %v514_v16 = vpop.f32.mrf.mxu0 }
  0xdf   : > { %v515_v17 = vadd.f32 %v2119_v38, %v514_v16 }
  0xe1   : > { %v661_v19 = vmax.f32 %v515_v17, 0.0 }
  0xe3   : > { %v720_v22 = vpack.c.bf16 %v661_v19, %v660_v18 }
  0xe5   : > { %844 = vmatmul.bf16.gmra.mxu1 %v720_v22 }
  0xe6   : > { %v517_v24 = vpop.f32.mrf.mxu0 }
  0xe7   : > { %v518_v25 = vadd.f32 %v2119_v38, %v517_v24  ;;  %v317_v24 = vld [vmem:[%s2064_s19 + $0x120] sm:$0xff] }
  0xe9   : > { %1544 = vmatmul.msk.bf16.gmra.mxu0 %vm382_vm1, %v358_v23  ;;  %v662_v29 = vmax.f32 %v518_v25, 0.0  ;;  %v318_v25 = vld [vmem:[%s2064_s19 + $0x128] sm:$0xff] }
  0xee   : > { %v519_v26 = vpop.f32.mrf.mxu0 }
  0xef   : > { %v520_v27 = vadd.f32 %v2119_v38, %v519_v26 }
  0xf1   : > { %v663_v30 = vmax.f32 %v520_v27, 0.0  ;;  %v363_v27 = vpack.c.bf16 %v318_v25, %v317_v24 }
  0xf3   : > { %v721_v33 = vpack.c.bf16 %v663_v30, %v662_v29 }
  0xf5   : > { %849 = vmatmul.bf16.gmra.mxu1 %v721_v33 }
  0xf6   : > { %v522_v36 = vpop.f32.mrf.mxu0 }
  0xf7   : > { %v523_v40 = vadd.f32 %v2119_v38, %v522_v36 }
  0xf9   : > { %1545 = vmatmul.msk.bf16.gmra.mxu0 %vm382_vm1, %v359_v35  ;;  %v664_v44 = vmax.f32 %v523_v40, 0.0 }
  0xfe   : > { %v524_v41 = vpop.f32.mrf.mxu0 }
  0xff   : > { %v525_v42 = vadd.f32 %v2119_v38, %v524_v41 }
 0x101   : > { %v665_v45 = vmax.f32 %v525_v42, 0.0 }
 0x103   : > { %v722_v48 = vpack.c.bf16 %v665_v45, %v664_v44 }
 0x105   : > { %854 = vmatmul.bf16.gmra.mxu1 %v722_v48  ;;  %v320_v48 = vld [vmem:[%s2064_s19 + $0x138] sm:$0xff] }
 0x106   : > { %v527_v51 = vpop.f32.mrf.mxu0 }
 0x107   : > { %v528_v54 = vadd.f32 %v2119_v38, %v527_v51  ;;  %v364_v51 = vpack.c.bf16 %v320_v48, %v319_v47 }
 0x109   : > { %1546 = vmatmul.msk.bf16.gmra.mxu0 %vm382_vm1, %v360_v50  ;;  %v666_v57 = vmax.f32 %v528_v54, 0.0 }
 0x10e   : > { %v529_v55 = vpop.f32.mrf.mxu0 }
 0x10f   : > { %v530_v56 = vadd.f32 %v2119_v38, %v529_v55 }
 0x111   : > { %v667_v58 = vmax.f32 %v530_v56, 0.0 }
 0x113   : > { %v723_v61 = vpack.c.bf16 %v667_v58, %v666_v57 }
 0x115   : > { %859 = vmatmul.bf16.gmra.mxu1 %v723_v61 }
 0x116   : > { %v532_v63 = vpop.f32.mrf.mxu0 }
 0x117   : > { %v533_v0 = vadd.f32 %v2119_v38, %v532_v63 }
 0x119   : > { %1547 = vmatmul.msk.bf16.gmra.mxu0 %vm382_vm1, %v361_v62  ;;  %v668_v3 = vmax.f32 %v533_v0, 0.0 }
 0x11e   : > { %v534_v1 = vpop.f32.mrf.mxu0 }
 0x11f   : > { %v535_v2 = vadd.f32 %v2119_v38, %v534_v1 }
 0x121   : > { %v669_v4 = vmax.f32 %v535_v2, 0.0 }
 0x122   : > { %v825_v5 = vpop.f32.mrf.mxu1 }
 0x123   : > { %v724_v8 = vpack.c.bf16 %v669_v4, %v668_v3  ;;  %v826_v12 = vadd.f32 %v2217_v9, %v825_v5  ;;  %v321_v3 = vld [vmem:[%s2064_s19 + $0x140] sm:$0xff]  ;;  %v322_v4 = vld [vmem:[%s2064_s19 + $0x148] sm:$0xff] }
 0x124   : > { %v365_v6 = vpack.c.bf16 %v322_v4, %v321_v3  ;;  %v327_v3 = vld [vmem:[%s2064_s19 + $0x170] sm:$0xff]  ;;  %v328_v4 = vld [vmem:[%s2064_s19 + $0x178] sm:$0xff] }
 0x125   : > { %864 = vmatmul.bf16.gmra.mxu1 %v724_v8  ;;  %v985_v15 = vmax.f32 %v826_v12, 0.0 }
 0x126   : > { %v537_v11 = vpop.f32.mrf.mxu0 }
 0x127   : > { %v538_v16 = vadd.f32 %v2119_v38, %v537_v11 }
 0x129   : > { %1548 = vmatmul.msk.bf16.gmra.mxu0 %vm382_vm1, %v362_v10  ;;  %v670_v21 = vmax.f32 %v538_v16, 0.0 }
 0x12a   : > { %v827_v13 = vpop.f32.mrf.mxu1 }
 0x12b   : > { %v828_v14 = vadd.f32 %v2217_v9, %v827_v13 }
 0x12d   : > { %v986_v17 = vmax.f32 %v828_v14, 0.0 }
 0x12e   : > { %v539_v18 = vpop.f32.mrf.mxu0 }
 0x12f   : > { %v540_v19 = vadd.f32 %v2119_v38, %v539_v18  ;;  %v1049_v20 = vpack.c.bf16 %v986_v17, %v985_v15 }
 0x131   : > { %v671_v22 = vmax.f32 %v540_v19, 0.0  ;;  %1157 = vmatmul.bf16.vlgmr.msra.gmra.mxu2 %v1049_v20 }
 0x132   : > { %v830_v23 = vpop.f32.mrf.mxu1 }
 0x133   : > { %v725_v26 = vpack.c.bf16 %v671_v22, %v670_v21  ;;  %v831_v30 = vadd.f32 %v2217_v9, %v830_v23  ;;  %v323_v21 = vld [vmem:[%s2064_s19 + $0x150] sm:$0xff]  ;;  %v324_v22 = vld [vmem:[%s2064_s19 + $0x158] sm:$0xff] }
 0x134   : > { %v366_v24 = vpack.c.bf16 %v324_v22, %v323_v21  ;;  %v330_v21 = vld [vmem:[%s2064_s19 + $0x188] sm:$0xff] }
 0x135   : > { %869 = vmatmul.bf16.gmra.mxu1 %v725_v26  ;;  %v987_v33 = vmax.f32 %v831_v30, 0.0 }
 0x136   : > { %v542_v29 = vpop.f32.mrf.mxu0 }
 0x137   : > { %v543_v35 = vadd.f32 %v2119_v38, %v542_v29 }
 0x139   : > { %1549 = vmatmul.msk.bf16.gmra.mxu0 %vm382_vm1, %v363_v27  ;;  %v672_v44 = vmax.f32 %v543_v35, 0.0 }
 0x13a   : > { %v832_v31 = vpop.f32.mrf.mxu1 }
 0x13b   : > { %v833_v32 = vadd.f32 %v2217_v9, %v832_v31 }
 0x13d   : > { %v988_v36 = vmax.f32 %v833_v32, 0.0 }
 0x13e   : > { %v544_v40 = vpop.f32.mrf.mxu0 }
 0x13f   : > { %v545_v41 = vadd.f32 %v2119_v38, %v544_v40  ;;  %v1050_v42 = vpack.c.bf16 %v988_v36, %v987_v33 }
 0x141   : > { %v673_v45 = vmax.f32 %v545_v41, 0.0  ;;  %1162 = vmatmul.bf16.gmra.mxu2 %v1050_v42 }
 0x142   : > { %v835_v46 = vpop.f32.mrf.mxu1 }
 0x143   : > { %v726_v50 = vpack.c.bf16 %v673_v45, %v672_v44  ;;  %v836_v55 = vadd.f32 %v2217_v9, %v835_v46  ;;  %v325_v44 = vld [vmem:[%s2064_s19 + $0x160] sm:$0xff]  ;;  %v326_v45 = vld [vmem:[%s2064_s19 + $0x168] sm:$0xff] }
 0x144   : > { %v367_v47 = vpack.c.bf16 %v326_v45, %v325_v44  ;;  %v337_v44 = vld [vmem:[%s2064_s19 + $0x1c0] sm:$0xff]  ;;  %v338_v45 = vld [vmem:[%s2064_s19 + $0x1c8] sm:$0xff] }
 0x145   : > { %874 = vmatmul.bf16.gmra.mxu1 %v726_v50  ;;  %v989_v58 = vmax.f32 %v836_v55, 0.0  ;;  %v331_v50 = vld [vmem:[%s2064_s19 + $0x190] sm:$0xff] }
 0x146   : > { %v547_v54 = vpop.f32.mrf.mxu0 }
 0x147   : > { %v548_v59 = vadd.f32 %v2119_v38, %v547_v54 }
 0x149   : > { %1550 = vmatmul.msk.bf16.gmra.mxu0 %vm382_vm1, %v364_v51  ;;  %v674_v0 = vmax.f32 %v548_v59, 0.0  ;;  %v332_v51 = vld [vmem:[%s2064_s19 + $0x198] sm:$0xff] }
 0x14a   : > { %v837_v56 = vpop.f32.mrf.mxu1  ;;  %v370_v55 = vpack.c.bf16 %v332_v51, %v331_v50 }
 0x14b   : > { %v838_v57 = vadd.f32 %v2217_v9, %v837_v56 }
 0x14c   : > { %1556 = vmatmul.msk.bf16.vlgmr.msra.gmra.mxu3 %vm382_vm1, %v370_v55 }
 0x14d   : > { %v990_v60 = vmax.f32 %v838_v57, 0.0  ;;  %1849 = vmatpush.bf16.msra.mxu3 %v2152_v28  ;;  %v368_v28 = vpack.c.bf16 %v328_v4, %v327_v3  ;;  %v340_v3 = vld [vmem:[%s2064_s19 + $0x1d8] sm:$0xff]  ;;  %v2304_v4 = vld [vmem:[%s2536_s6] ss:$0 sm:$0xff] }
 0x14e   : > { %v549_v61 = vpop.f32.mrf.mxu0 }
 0x14f   : > { %v550_v62 = vadd.f32 %v2119_v38, %v549_v61  ;;  %v1051_v63 = vpack.c.bf16 %v990_v60, %v989_v58 }
 0x151   : > { %v675_v1 = vmax.f32 %v550_v62, 0.0  ;;  %1167 = vmatmul.bf16.gmra.mxu2 %v1051_v63  ;;  %1850 = vmatpush.bf16.msra.mxu3 %v2160_v34 }
 0x152   : > { %v840_v2 = vpop.f32.mrf.mxu1 }
 0x153   : > { %v727_v5 = vpack.c.bf16 %v675_v1, %v674_v0  ;;  %v841_v8 = vadd.f32 %v2217_v9, %v840_v2 }
 0x155   : > { %879 = vmatmul.bf16.gmra.mxu1 %v727_v5  ;;  %v991_v12 = vmax.f32 %v841_v8, 0.0  ;;  %1851 = vmatpush.bf16.msra.mxu3 %v2166_v37  ;;  %v334_v8 = vld [vmem:[%s2064_s19 + $0x1a8] sm:$0xff] }
 0x156   : > { %v552_v7 = vpop.f32.mrf.mxu0 }
 0x157   : > { %v553_v13 = vadd.f32 %v2119_v38, %v552_v7  ;;  %v333_v7 = vld [vmem:[%s2064_s19 + $0x1a0] sm:$0xff] }
 0x158   : > { %v371_v34 = vpack.c.bf16 %v334_v8, %v333_v7 }
 0x159   : > { %1551 = vmatmul.msk.bf16.gmra.mxu0 %vm382_vm1, %v365_v6  ;;  %v676_v18 = vmax.f32 %v553_v13, 0.0  ;;  %1852 = vmatpush.bf16.msra.mxu3 %v2173_v39 }
 0x15a   : > { %v842_v10 = vpop.f32.mrf.mxu1 }
 0x15b   : > { %v843_v11 = vadd.f32 %v2217_v9, %v842_v10 }
 0x15c   : > { %1557 = vmatmul.msk.bf16.gmra.mxu3 %vm382_vm1, %v371_v34 }
 0x15d   : > { %v992_v14 = vmax.f32 %v843_v11, 0.0  ;;  %1853 = vmatpush.bf16.msra.mxu3 %v2181_v43 }
 0x15e   : > { %v554_v15 = vpop.f32.mrf.mxu0 }
 0x15f   : > { %v555_v16 = vadd.f32 %v2119_v38, %v554_v15  ;;  %v1052_v17 = vpack.c.bf16 %v992_v14, %v991_v12 }
 0x161   : > { %v677_v19 = vmax.f32 %v555_v16, 0.0  ;;  %1172 = vmatmul.bf16.gmra.mxu2 %v1052_v17  ;;  %1854 = vmatpush.bf16.msra.mxu3 %v2189_v49 }
 0x162   : > { %v845_v20 = vpop.f32.mrf.mxu1 }
 0x163   : > { %v728_v23 = vpack.c.bf16 %v677_v19, %v676_v18  ;;  %v846_v26 = vadd.f32 %v2217_v9, %v845_v20  ;;  %v329_v20 = vld [vmem:[%s2064_s19 + $0x180] sm:$0xff] }
 0x164   : > { %v369_v43 = vpack.c.bf16 %v330_v21, %v329_v20 }
 0x165   : > { %884 = vmatmul.bf16.gmra.mxu1 %v728_v23  ;;  %v993_v30 = vmax.f32 %v846_v26, 0.0  ;;  %1855 = vmatpush.bf16.msra.mxu3 %v2195_v52 }
 0x166   : > { %v557_v25 = vpop.f32.mrf.mxu0 }
 0x167   : > { %v558_v31 = vadd.f32 %v2119_v38, %v557_v25  ;;  %v336_v25 = vld [vmem:[%s2064_s19 + $0x1b8] sm:$0xff] }
 0x169   : > { %1552 = vmatmul.msk.bf16.gmra.mxu0 %vm382_vm1, %v366_v24  ;;  %v678_v40 = vmax.f32 %v558_v31, 0.0  ;;  %v335_v24 = vld [vmem:[%s2064_s19 + $0x1b0] sm:$0xff]  ;;  %1856 = vmatpush.bf16.msra.mxu3 %v2202_v53 }
 0x16a   : > { %v847_v27 = vpop.f32.mrf.mxu1  ;;  %v372_v49 = vpack.c.bf16 %v336_v25, %v335_v24 }
 0x16b   : > { %v848_v29 = vadd.f32 %v2217_v9, %v847_v27 }
 0x16c   : > { %1558 = vmatmul.msk.bf16.gmra.mxu3 %vm382_vm1, %v372_v49 }
 0x16d   : > { %v994_v32 = vmax.f32 %v848_v29, 0.0 }
 0x16e   : > { %v559_v33 = vpop.f32.mrf.mxu0 }
 0x16f   : > { %v560_v35 = vadd.f32 %v2119_v38, %v559_v33  ;;  %v1053_v36 = vpack.c.bf16 %v994_v32, %v993_v30 }
 0x171   : > { %v679_v41 = vmax.f32 %v560_v35, 0.0  ;;  %1177 = vmatmul.bf16.gmra.mxu2 %v1053_v36 }
 0x172   : > { %v850_v42 = vpop.f32.mrf.mxu1 }
 0x173   : > { %v729_v46 = vpack.c.bf16 %v679_v41, %v678_v40  ;;  %v851_v54 = vadd.f32 %v2217_v9, %v850_v42 }
 0x175   : > { %889 = vmatmul.bf16.gmra.mxu1 %v729_v46  ;;  %v995_v58 = vmax.f32 %v851_v54, 0.0 }
 0x176   : > { %v562_v48 = vpop.f32.mrf.mxu0 }
 0x177   : > { %v563_v59 = vadd.f32 %v2119_v38, %v562_v48 }
 0x179   : > { %1553 = vmatmul.msk.bf16.gmra.mxu0 %vm382_vm1, %v367_v47  ;;  %v680_v0 = vmax.f32 %v563_v59, 0.0  ;;  %v373_v47 = vpack.c.bf16 %v338_v45, %v337_v44 }
 0x17a   : > { %v852_v56 = vpop.f32.mrf.mxu1 }
 0x17b   : > { %v853_v57 = vadd.f32 %v2217_v9, %v852_v56 }
 0x17c   : > { %1559 = vmatmul.msk.bf16.gmra.mxu3 %vm382_vm1, %v373_v47  ;;  %v344_v47 = vld [vmem:[%s2064_s19 + $0x1f8] sm:$0xff] }
 0x17d   : > { %v996_v60 = vmax.f32 %v853_v57, 0.0 }
 0x17e   : > { %v564_v61 = vpop.f32.mrf.mxu0 }
 0x17f   : > { %v565_v62 = vadd.f32 %v2119_v38, %v564_v61  ;;  %v1054_v63 = vpack.c.bf16 %v996_v60, %v995_v58 }
 0x181   : > { %v681_v1 = vmax.f32 %v565_v62, 0.0  ;;  %1182 = vmatmul.bf16.gmra.mxu2 %v1054_v63 }
 0x182   : > { %v855_v2 = vpop.f32.mrf.mxu1 }
 0x183   : > { %v730_v5 = vpack.c.bf16 %v681_v1, %v680_v0  ;;  %v856_v10 = vadd.f32 %v2217_v9, %v855_v2  ;;  %v339_v2 = vld [vmem:[%s2064_s19 + $0x1d0] sm:$0xff] }
 0x185   : > { %894 = vmatmul.bf16.gmra.mxu1 %v730_v5  ;;  %v997_v37 = vmax.f32 %v856_v10, 0.0  ;;  %v374_v5 = vpack.c.bf16 %v340_v3, %v339_v2 }
 0x186   : > { %v567_v6 = vpop.f32.mrf.mxu0 }
 0x187   : > { %v568_v13 = vadd.f32 %v2119_v38, %v567_v6 }
 0x189   : > { %1554 = vmatmul.msk.bf16.gmra.mxu0 %vm382_vm1, %v368_v28  ;;  %v682_v17 = vmax.f32 %v568_v13, 0.0 }
 0x18a   : > { %v857_v11 = vpop.f32.mrf.mxu1 }
 0x18b   : > { %v858_v12 = vadd.f32 %v2217_v9, %v857_v11 }
 0x18c   : > { %1560 = vmatmul.msk.bf16.gmra.mxu3 %vm382_vm1, %v374_v5 }
 0x18d   : > { %v998_v14 = vmax.f32 %v858_v12, 0.0 }
 0x18e   : > { %v569_v39 = vpop.f32.mrf.mxu0 }
 0x18f   : > { %v570_v15 = vadd.f32 %v2119_v38, %v569_v39  ;;  %v1055_v16 = vpack.c.bf16 %v998_v14, %v997_v37 }
 0x191   : > { %v683_v18 = vmax.f32 %v570_v15, 0.0  ;;  %1187 = vmatmul.bf16.gmra.mxu2 %v1055_v16 }
 0x192   : > { %v860_v19 = vpop.f32.mrf.mxu1 }
 0x193   : > { %v731_v22 = vpack.c.bf16 %v683_v18, %v682_v17  ;;  %v861_v26 = vadd.f32 %v2217_v9, %v860_v19 }
 0x195   : > { %899 = vmatmul.bf16.gmra.mxu1 %v731_v22  ;;  %v999_v52 = vmax.f32 %v861_v26, 0.0  ;;  %v341_v22 = vld [vmem:[%s2064_s19 + $0x1e0] sm:$0xff] }
 0x196   : > { %v572_v23 = vpop.f32.mrf.mxu0 }
 0x197   : > { %v573_v30 = vadd.f32 %v2119_v38, %v572_v23 }
 0x199   : > { %1555 = vmatmul.msk.bf16.gmra.mxu0 %vm382_vm1, %v369_v43  ;;  %v684_v35 = vmax.f32 %v573_v30, 0.0  ;;  %v342_v43 = vld [vmem:[%s2064_s19 + $0x1e8] sm:$0xff] }
 0x19a   : > { %v862_v27 = vpop.f32.mrf.mxu1  ;;  %v375_v23 = vpack.c.bf16 %v342_v43, %v341_v22 }
 0x19b   : > { %v863_v29 = vadd.f32 %v2217_v9, %v862_v27 }
 0x19c   : > { %1561 = vmatmul.msk.bf16.gmra.mxu3 %vm382_vm1, %v375_v23 }
 0x19d   : > { %v1000_v31 = vmax.f32 %v863_v29, 0.0 }
 0x19e   : > { %v574_v32 = vpop.f32.mrf.mxu0 }
 0x19f   : > { %v575_v33 = vadd.f32 %v2119_v38, %v574_v32  ;;  %v1056_v53 = vpack.c.bf16 %v1000_v31, %v999_v52 }
 0x1a1   : > { %v685_v36 = vmax.f32 %v575_v33, 0.0  ;;  %1192 = vmatmul.bf16.gmra.mxu2 %v1056_v53 }
 0x1a2   : > { %v865_v40 = vpop.f32.mrf.mxu1 }
 0x1a3   : > { %v732_v41 = vpack.c.bf16 %v685_v36, %v684_v35  ;;  %v866_v46 = vadd.f32 %v2217_v9, %v865_v40 }
 0x1a5   : > { %904 = vmatmul.bf16.gmra.mxu1 %v732_v41  ;;  %v1001_v51 = vmax.f32 %v866_v46, 0.0  ;;  %v343_v46 = vld [vmem:[%s2064_s19 + $0x1f0] sm:$0xff] }
 0x1a6   : > { %v577_v42 = vpop.f32.mrf.mxu0 }
 0x1a7   : > { %v578_v54 = vadd.f32 %v2119_v38, %v577_v42 }
 0x1a9   : > { %v686_v59 = vmax.f32 %v578_v54, 0.0 }
 0x1aa   : > { %v867_v48 = vpop.f32.mrf.mxu1 }
 0x1ab   : > { %v868_v50 = vadd.f32 %v2217_v9, %v867_v48  ;;  %v376_v48 = vpack.c.bf16 %v344_v47, %v343_v46 }
 0x1ad   : > { %v1002_v55 = vmax.f32 %v868_v50, 0.0  ;;  %1562 = vmatmul.msk.bf16.gmra.mxu3 %vm382_vm1, %v376_v48 }
 0x1ae   : > { %v579_v56 = vpop.f32.mrf.mxu0 }
 0x1af   : > { %v580_v57 = vadd.f32 %v2119_v38, %v579_v56  ;;  %v1057_v58 = vpack.c.bf16 %v1002_v55, %v1001_v51 }
 0x1b1   : > { %v687_v60 = vmax.f32 %v580_v57, 0.0  ;;  %1197 = vmatmul.bf16.gmra.mxu2 %v1057_v58 }
 0x1b2   : > { %v870_v61 = vpop.f32.mrf.mxu1 }
 0x1b3   : > { %v733_v62 = vpack.c.bf16 %v687_v60, %v686_v59  ;;  %v871_v1 = vadd.f32 %v2217_v9, %v870_v61 }
 0x1b4   : > { %v1158_v63 = vpop.f32.mrf.mxu2 }
 0x1b5   : > { %909 = vmatmul.bf16.gmra.mxu1 %v733_v62  ;;  %v1003_v7 = vmax.f32 %v871_v1, 0.0  ;;  %v1159_v10 = vadd.f32 %v2304_v4, %v1158_v63 }
 0x1b6   : > { %v582_v0 = vpop.f32.mrf.mxu0 }
 0x1b7   : > { %v583_v34 = vadd.f32 %v2119_v38, %v582_v0 }
 0x1b9   : > { %v688_v15 = vmax.f32 %v583_v34, 0.0 }
 0x1ba   : > { %v872_v28 = vpop.f32.mrf.mxu1 }
 0x1bb   : > { %v873_v6 = vadd.f32 %v2217_v9, %v872_v28 }
 0x1bc   : > { %v1160_v8 = vpop.f32.mrf.mxu2 }
 0x1bd   : > { %v1004_v11 = vmax.f32 %v873_v6, 0.0  ;;  %v1161_v12 = vadd.f32 %v2304_v4, %v1160_v8 }
 0x1be   : > { %v584_v37 = vpop.f32.mrf.mxu0 }
 0x1bf   : > { %v1652_v13 = vpack.c.bf16 %v1161_v12, %v1159_v10  ;;  %v585_v14 = vadd.f32 %v2119_v38, %v584_v37  ;;  %v1058_v39 = vpack.c.bf16 %v1004_v11, %v1003_v7 }
 0x1c1   : > { %1653 = vst [vmem:[%s2314_s21] sm:$0xff] %v1652_v13   ;;  %v689_v16 = vmax.f32 %v585_v14, 0.0  ;;  %1202 = vmatmul.bf16.gmra.mxu2 %v1058_v39 }
 0x1c2   : > { %v875_v17 = vpop.f32.mrf.mxu1 }
 0x1c3   : > { %v734_v18 = vpack.c.bf16 %v689_v16, %v688_v15  ;;  %v876_v21 = vadd.f32 %v2217_v9, %v875_v17 }
 0x1c4   : > { %v1163_v19 = vpop.f32.mrf.mxu2 }
 0x1c5   : > { %914 = vmatmul.bf16.gmra.mxu1 %v734_v18  ;;  %v1005_v26 = vmax.f32 %v876_v21, 0.0  ;;  %v1164_v27 = vadd.f32 %v2304_v4, %v1163_v19 }
 0x1c6   : > { %v587_v20 = vpop.f32.mrf.mxu0 }
 0x1c7   : > { %v588_v29 = vadd.f32 %v2119_v38, %v587_v20 }
 0x1c9   : > { %v690_v35 = vmax.f32 %v588_v29, 0.0 }
 0x1ca   : > { %v877_v24 = vpop.f32.mrf.mxu1 }
 0x1cb   : > { %v878_v25 = vadd.f32 %v2217_v9, %v877_v24 }
 0x1cc   : > { %v1165_v49 = vpop.f32.mrf.mxu2 }
 0x1cd   : > { %v1006_v52 = vmax.f32 %v878_v25, 0.0  ;;  %v1166_v30 = vadd.f32 %v2304_v4, %v1165_v49 }
 0x1ce   : > { %v589_v31 = vpop.f32.mrf.mxu0 }
 0x1cf   : > { %v1657_v32 = vpack.c.bf16 %v1166_v30, %v1164_v27  ;;  %v590_v33 = vadd.f32 %v2119_v38, %v589_v31  ;;  %v1059_v53 = vpack.c.bf16 %v1006_v52, %v1005_v26 }
 0x1d1   : > { %1809 = vst [vmem:[%s2314_s21 + $0x8] sm:$0xff] %v1657_v32   ;;  %v691_v36 = vmax.f32 %v590_v33, 0.0  ;;  %1207 = vmatmul.bf16.gmra.mxu2 %v1059_v53 }
 0x1d2   : > { %v880_v40 = vpop.f32.mrf.mxu1 }
 0x1d3   : > { %v735_v41 = vpack.c.bf16 %v691_v36, %v690_v35  ;;  %v881_v45 = vadd.f32 %v2217_v9, %v880_v40 }
 0x1d4   : > { %v1168_v42 = vpop.f32.mrf.mxu2 }
 0x1d5   : > { %919 = vmatmul.bf16.gmra.mxu1 %v735_v41  ;;  %v1007_v54 = vmax.f32 %v881_v45, 0.0  ;;  %v1169_v56 = vadd.f32 %v2304_v4, %v1168_v42 }
 0x1d6   : > { %v592_v44 = vpop.f32.mrf.mxu0 }
 0x1d7   : > { %v593_v57 = vadd.f32 %v2119_v38, %v592_v44  ;;  %v617_v44 = vpop.f32.mrf.mxu3 }
 0x1d9   : > { %v692_v0 = vmax.f32 %v593_v57, 0.0 }
 0x1da   : > { %v882_v50 = vpop.f32.mrf.mxu1 }
 0x1db   : > { %v883_v51 = vadd.f32 %v2217_v9, %v882_v50 }
 0x1dc   : > { %v1170_v55 = vpop.f32.mrf.mxu2 }
 0x1dd   : > { %v1008_v58 = vmax.f32 %v883_v51, 0.0  ;;  %v1171_v59 = vadd.f32 %v2304_v4, %v1170_v55 }
 0x1de   : > { %v594_v60 = vpop.f32.mrf.mxu0 }
 0x1df   : > { %v1662_v61 = vpack.c.bf16 %v1171_v59, %v1169_v56  ;;  %v595_v62 = vadd.f32 %v2119_v38, %v594_v60  ;;  %v1060_v63 = vpack.c.bf16 %v1008_v58, %v1007_v54 }
 0x1e1   : > { %1810 = vst [vmem:[%s2314_s21 + $0x10] sm:$0xff] %v1662_v61   ;;  %v693_v1 = vmax.f32 %v595_v62, 0.0  ;;  %1212 = vmatmul.bf16.gmra.mxu2 %v1060_v63  ;;  %v619_v61 = vpop.f32.mrf.mxu3 }
 0x1e2   : > { %v885_v2 = vpop.f32.mrf.mxu1 }
 0x1e3   : > { %v736_v3 = vpack.c.bf16 %v693_v1, %v692_v0  ;;  %v886_v6 = vadd.f32 %v2217_v9, %v885_v2 }
 0x1e4   : > { %v1173_v5 = vpop.f32.mrf.mxu2 }
 0x1e5   : > { %924 = vmatmul.bf16.gmra.mxu1 %v736_v3  ;;  %v1009_v10 = vmax.f32 %v886_v6, 0.0  ;;  %v1174_v11 = vadd.f32 %v2304_v4, %v1173_v5 }
 0x1e6   : > { %v597_v28 = vpop.f32.mrf.mxu0 }
 0x1e7   : > { %v598_v12 = vadd.f32 %v2119_v38, %v597_v28 }
 0x1e9   : > { %v694_v17 = vmax.f32 %v598_v12, 0.0  ;;  %v622_v6 = vpop.f32.mrf.mxu3 }
 0x1ea   : > { %v887_v7 = vpop.f32.mrf.mxu1 }
 0x1eb   : > { %v888_v8 = vadd.f32 %v2217_v9, %v887_v7 }
 0x1ec   : > { %v1175_v34 = vpop.f32.mrf.mxu2 }
 0x1ed   : > { %v1010_v37 = vmax.f32 %v888_v8, 0.0  ;;  %v1176_v13 = vadd.f32 %v2304_v4, %v1175_v34 }
 0x1ee   : > { %v599_v14 = vpop.f32.mrf.mxu0 }
 0x1ef   : > { %v1061_v39 = vpack.c.bf16 %v1010_v37, %v1009_v10  ;;  %v1667_v15 = vpack.c.bf16 %v1176_v13, %v1174_v11  ;;  %v600_v16 = vadd.f32 %v2119_v38, %v599_v14 }
 0x1f1   : > { %1811 = vst [vmem:[%s2314_s21 + $0x18] sm:$0xff] %v1667_v15   ;;  %v695_v18 = vmax.f32 %v600_v16, 0.0  ;;  %1217 = vmatmul.bf16.gmra.mxu2 %v1061_v39 }
 0x1f2   : > { %v890_v19 = vpop.f32.mrf.mxu1 }
 0x1f3   : > { %v737_v20 = vpack.c.bf16 %v695_v18, %v694_v17  ;;  %v891_v43 = vadd.f32 %v2217_v9, %v890_v19 }
 0x1f4   : > { %v1178_v21 = vpop.f32.mrf.mxu2 }
 0x1f5   : > { %929 = vmatmul.bf16.gmra.mxu1 %v737_v20  ;;  %v1011_v25 = vmax.f32 %v891_v43, 0.0  ;;  %v1179_v49 = vadd.f32 %v2304_v4, %v1178_v21  ;;  %v624_v21 = vpop.f32.mrf.mxu3 }
 0x1f6   : > { %v602_v22 = vpop.f32.mrf.mxu0 }
 0x1f7   : > { %v603_v27 = vadd.f32 %v2119_v38, %v602_v22 }
 0x1f9   : > { %v696_v53 = vmax.f32 %v603_v27, 0.0 }
 0x1fa   : > { %v892_v23 = vpop.f32.mrf.mxu1 }
 0x1fb   : > { %v893_v24 = vadd.f32 %v2217_v9, %v892_v23  ;;  %v618_v23 = vadd.f32 %v2119_v38, %v617_v44  ;;  %v2376_v44 = vld [vmem:[%s2532_s2] ss:$0 sm:$0xff] }
 0x1fc   : > { %v1180_v26 = vpop.f32.mrf.mxu2 }
 0x1fd   : > { %v1012_v29 = vmax.f32 %v893_v24, 0.0  ;;  %v1181_v52 = vadd.f32 %v2304_v4, %v1180_v26  ;;  %v620_v24 = vadd.f32 %v2119_v38, %v619_v61 }
 0x1fe   : > { %v604_v30 = vpop.f32.mrf.mxu0 }
 0x1ff   : > { %v1062_v31 = vpack.c.bf16 %v1012_v29, %v1011_v25  ;;  %v1672_v32 = vpack.c.bf16 %v1181_v52, %v1179_v49  ;;  %v605_v33 = vadd.f32 %v2119_v38, %v604_v30  ;;  %v627_v30 = vpop.f32.mrf.mxu3 }
 0x201   : > { %1812 = vst [vmem:[%s2314_s21 + $0x20] sm:$0xff] %v1672_v32   ;;  %v697_v35 = vmax.f32 %v605_v33, 0.0  ;;  %1222 = vmatmul.bf16.gmra.mxu2 %v1062_v31  ;;  %v702_v31 = vmax.f32 %v618_v23, 0.0  ;;  %v703_v32 = vmax.f32 %v620_v24, 0.0 }
 0x202   : > { %v895_v36 = vpop.f32.mrf.mxu1 }
 0x203   : > { %v738_v40 = vpack.c.bf16 %v697_v35, %v696_v53  ;;  %v896_v45 = vadd.f32 %v2217_v9, %v895_v36  ;;  %v741_v36 = vpack.c.bf16 %v703_v32, %v702_v31 }
 0x204   : > { %v1183_v41 = vpop.f32.mrf.mxu2 }
 0x205   : > { %934 = vmatmul.bf16.gmra.mxu1 %v738_v40  ;;  %v1013_v48 = vmax.f32 %v896_v45, 0.0  ;;  %v1184_v51 = vadd.f32 %v2304_v4, %v1183_v41  ;;  %v623_v45 = vadd.f32 %v2376_v44, %v622_v6 }
 0x206   : > { %v607_v42 = vpop.f32.mrf.mxu0 }
 0x207   : > { %v608_v54 = vadd.f32 %v2119_v38, %v607_v42 }
 0x209   : > { %v698_v62 = vmax.f32 %v608_v54, 0.0 }
 0x20a   : > { %v897_v46 = vpop.f32.mrf.mxu1 }
 0x20b   : > { %v898_v47 = vadd.f32 %v2217_v9, %v897_v46  ;;  %v625_v46 = vadd.f32 %v2376_v44, %v624_v21 }
 0x20c   : > { %v1185_v50 = vpop.f32.mrf.mxu2 }
 0x20d   : > { %v1014_v55 = vmax.f32 %v898_v47, 0.0  ;;  %v1186_v56 = vadd.f32 %v2304_v4, %v1185_v50 }
 0x20e   : > { %v609_v57 = vpop.f32.mrf.mxu0 }
 0x20f   : > { %v1063_v58 = vpack.c.bf16 %v1014_v55, %v1013_v48  ;;  %v1677_v59 = vpack.c.bf16 %v1186_v56, %v1184_v51  ;;  %v610_v60 = vadd.f32 %v2119_v38, %v609_v57  ;;  %v704_v56 = vmax.f32 %v623_v45, 0.0 }
 0x210   : > { %v705_v57 = vmax.f32 %v625_v46, 0.0 }
 0x211   : > { %1813 = vst [vmem:[%s2314_s21 + $0x28] sm:$0xff] %v1677_v59   ;;  %v699_v63 = vmax.f32 %v610_v60, 0.0  ;;  %1227 = vmatmul.bf16.gmra.mxu2 %v1063_v58 }
 0x212   : > { %v900_v0 = vpop.f32.mrf.mxu1 }
 0x213   : > { %v739_v1 = vpack.c.bf16 %v699_v63, %v698_v62  ;;  %v901_v5 = vadd.f32 %v2217_v9, %v900_v0  ;;  %v742_v62 = vpack.c.bf16 %v705_v57, %v704_v56 }
 0x214   : > { %v1188_v2 = vpop.f32.mrf.mxu2 }
 0x215   : > { %939 = vmatmul.bf16.gmra.mxu1 %v739_v1  ;;  %v1015_v8 = vmax.f32 %v901_v5, 0.0  ;;  %v1189_v34 = vadd.f32 %v2304_v4, %v1188_v2  ;;  %v628_v2 = vadd.f32 %v2376_v44, %v627_v30 }
 0x216   : > { %v612_v3 = vpop.f32.mrf.mxu0 }
 0x217   : > { %v613_v11 = vadd.f32 %v2119_v38, %v612_v3 }
 0x219   : > { %v700_v16 = vmax.f32 %v613_v11, 0.0  ;;  %v706_v11 = vmax.f32 %v628_v2, 0.0 }
 0x21a   : > { %v902_v28 = vpop.f32.mrf.mxu1 }
 0x21b   : > { %v903_v7 = vadd.f32 %v2217_v9, %v902_v28 }
 0x21c   : > { %v1190_v10 = vpop.f32.mrf.mxu2 }
 0x21d   : > { %v1016_v12 = vmax.f32 %v903_v7, 0.0  ;;  %v1191_v37 = vadd.f32 %v2304_v4, %v1190_v10 }
 0x21e   : > { %v614_v13 = vpop.f32.mrf.mxu0 }
 0x21f   : > { %v1064_v14 = vpack.c.bf16 %v1016_v12, %v1015_v8  ;;  %v1682_v39 = vpack.c.bf16 %v1191_v37, %v1189_v34  ;;  %v615_v15 = vadd.f32 %v2119_v38, %v614_v13  ;;  %v629_v38 = vpop.f32.mrf.mxu3 }
 0x220   : > { %v630_v3 = vadd.f32 %v2376_v44, %v629_v38 }
 0x221   : > { %1814 = vst [vmem:[%s2314_s21 + $0x30] sm:$0xff] %v1682_v39   ;;  %v701_v17 = vmax.f32 %v615_v15, 0.0  ;;  %1232 = vmatmul.bf16.gmra.mxu2 %v1064_v14 }
 0x222   : > { %v905_v18 = vpop.f32.mrf.mxu1  ;;  %v707_v12 = vmax.f32 %v630_v3, 0.0 }
 0x223   : > { %v740_v19 = vpack.c.bf16 %v701_v17, %v700_v16  ;;  %v906_v22 = vadd.f32 %v2217_v9, %v905_v18 }
 0x224   : > { %v1193_v20 = vpop.f32.mrf.mxu2  ;;  %v743_v39 = vpack.c.bf16 %v707_v12, %v706_v11 }
 0x225   : > { %944 = vmatmul.bf16.vlgmr.msrb.gmra.mxu3 %v740_v19  ;;  %v1017_v49 = vmax.f32 %v906_v22, 0.0  ;;  %v1194_v27 = vadd.f32 %v2304_v4, %v1193_v20 }
 0x227   : > { %v632_v61 = vpop.f32.mrf.mxu3 }
 0x228   : > { %v633_v19 = vadd.f32 %v2376_v44, %v632_v61 }
 0x22a   : > { %v907_v43 = vpop.f32.mrf.mxu1 }
 0x22b   : > { %v908_v25 = vadd.f32 %v2217_v9, %v907_v43 }
 0x22c   : > { %v1195_v26 = vpop.f32.mrf.mxu2 }
 0x22d   : > { %v1018_v29 = vmax.f32 %v908_v25, 0.0  ;;  %v1196_v52 = vadd.f32 %v2304_v4, %v1195_v26  ;;  %v708_v26 = vmax.f32 %v633_v19, 0.0 }
 0x22f   : > { %v1065_v33 = vpack.c.bf16 %v1018_v29, %v1017_v49  ;;  %v1687_v53 = vpack.c.bf16 %v1196_v52, %v1194_v27  ;;  %v634_v6 = vpop.f32.mrf.mxu3 }
 0x230   : > { %v635_v20 = vadd.f32 %v2376_v44, %v634_v6 }
 0x231   : > { %1815 = vst [vmem:[%s2314_s21 + $0x38] sm:$0xff] %v1687_v53   ;;  %1237 = vmatmul.bf16.gmra.mxu2 %v1065_v33 }
 0x232   : > { %v910_v35 = vpop.f32.mrf.mxu1  ;;  %v709_v49 = vmax.f32 %v635_v20, 0.0 }
 0x233   : > { %v911_v41 = vadd.f32 %v2217_v9, %v910_v35 }
 0x234   : > { %v1198_v40 = vpop.f32.mrf.mxu2  ;;  %v744_v31 = vpack.c.bf16 %v709_v49, %v708_v26 }
 0x235   : > { %949 = vmatmul.bf16.gmra.mxu3 %v741_v36  ;;  %v1019_v50 = vmax.f32 %v911_v41, 0.0  ;;  %v1199_v51 = vadd.f32 %v2304_v4, %v1198_v40 }
 0x237   : > { %v637_v16 = vpop.f32.mrf.mxu3 }
 0x238   : > { %v638_v36 = vadd.f32 %v2376_v44, %v637_v16 }
 0x23a   : > { %v912_v42 = vpop.f32.mrf.mxu1 }
 0x23b   : > { %v913_v47 = vadd.f32 %v2217_v9, %v912_v42 }
 0x23c   : > { %v1200_v48 = vpop.f32.mrf.mxu2 }
 0x23d   : > { %v1020_v54 = vmax.f32 %v913_v47, 0.0  ;;  %v1201_v55 = vadd.f32 %v2304_v4, %v1200_v48  ;;  %v710_v48 = vmax.f32 %v638_v36, 0.0 }
 0x23f   : > { %v1066_v58 = vpack.c.bf16 %v1020_v54, %v1019_v50  ;;  %v1692_v59 = vpack.c.bf16 %v1201_v55, %v1199_v51  ;;  %v639_v52 = vpop.f32.mrf.mxu3 }
 0x240   : > { %v640_v40 = vadd.f32 %v2376_v44, %v639_v52 }
 0x241   : > { %1816 = vst [vmem:[%s2314_s21 + $0x40] sm:$0xff] %v1692_v59   ;;  %1242 = vmatmul.bf16.gmra.mxu2 %v1066_v58 }
 0x242   : > { %v915_v60 = vpop.f32.mrf.mxu1  ;;  %v711_v50 = vmax.f32 %v640_v40, 0.0 }
 0x243   : > { %v916_v0 = vadd.f32 %v2217_v9, %v915_v60 }
 0x244   : > { %v1203_v63 = vpop.f32.mrf.mxu2  ;;  %v745_v56 = vpack.c.bf16 %v711_v50, %v710_v48 }
 0x245   : > { %954 = vmatmul.bf16.gmra.mxu3 %v742_v62  ;;  %v1021_v7 = vmax.f32 %v916_v0, 0.0  ;;  %v1204_v8 = vadd.f32 %v2304_v4, %v1203_v63 }
 0x247   : > { %v642_v35 = vpop.f32.mrf.mxu3 }
 0x248   : > { %v643_v61 = vadd.f32 %v2376_v44, %v642_v35 }
 0x24a   : > { %v917_v1 = vpop.f32.mrf.mxu1  ;;  %v712_v6 = vmax.f32 %v643_v61, 0.0 }
 0x24b   : > { %v918_v5 = vadd.f32 %v2217_v9, %v917_v1 }
 0x24c   : > { %v1205_v28 = vpop.f32.mrf.mxu2 }
 0x24d   : > { %v1022_v10 = vmax.f32 %v918_v5, 0.0  ;;  %v1206_v34 = vadd.f32 %v2304_v4, %v1205_v28 }
 0x24f   : > { %v1067_v37 = vpack.c.bf16 %v1022_v10, %v1021_v7  ;;  %v1697_v13 = vpack.c.bf16 %v1206_v34, %v1204_v8  ;;  %v644_v58 = vpop.f32.mrf.mxu3 }
 0x250   : > { %v645_v62 = vadd.f32 %v2376_v44, %v644_v58 }
 0x251   : > { %1817 = vst [vmem:[%s2314_s21 + $0x48] sm:$0xff] %v1697_v13   ;;  %1247 = vmatmul.bf16.gmra.mxu2 %v1067_v37 }
 0x252   : > { %v920_v14 = vpop.f32.mrf.mxu1  ;;  %v713_v7 = vmax.f32 %v645_v62, 0.0 }
 0x253   : > { %v921_v17 = vadd.f32 %v2217_v9, %v920_v14 }
 0x254   : > { %v1208_v15 = vpop.f32.mrf.mxu2  ;;  %v746_v11 = vpack.c.bf16 %v713_v7, %v712_v6 }
 0x255   : > { %959 = vmatmul.bf16.gmra.mxu3 %v743_v39  ;;  %v1023_v43 = vmax.f32 %v921_v17, 0.0  ;;  %v1209_v23 = vadd.f32 %v2304_v4, %v1208_v15 }
 0x257   : > { %v647_v28 = vpop.f32.mrf.mxu3 }
 0x258   : > { %v648_v39 = vadd.f32 %v2376_v44, %v647_v28 }
 0x25a   : > { %v922_v18 = vpop.f32.mrf.mxu1 }
 0x25b   : > { %v923_v21 = vadd.f32 %v2217_v9, %v922_v18 }
 0x25c   : > { %v1210_v22 = vpop.f32.mrf.mxu2 }
 0x25d   : > { %v1024_v24 = vmax.f32 %v923_v21, 0.0  ;;  %v1211_v25 = vadd.f32 %v2304_v4, %v1210_v22  ;;  %v714_v22 = vmax.f32 %v648_v39, 0.0 }
 0x25f   : > { %v1068_v27 = vpack.c.bf16 %v1024_v24, %v1023_v43  ;;  %v1702_v29 = vpack.c.bf16 %v1211_v25, %v1209_v23  ;;  %v649_v37 = vpop.f32.mrf.mxu3 }
 0x260   : > { %v650_v15 = vadd.f32 %v2376_v44, %v649_v37 }
 0x261   : > { %1818 = vst [vmem:[%s2314_s21 + $0x50] sm:$0xff] %v1702_v29   ;;  %1252 = vmatmul.bf16.gmra.mxu2 %v1068_v27 }
 0x262   : > { %v925_v30 = vpop.f32.mrf.mxu1  ;;  %v715_v43 = vmax.f32 %v650_v15, 0.0 }
 0x263   : > { %v926_v33 = vadd.f32 %v2217_v9, %v925_v30 }
 0x264   : > { %v1213_v32 = vpop.f32.mrf.mxu2  ;;  %v747_v26 = vpack.c.bf16 %v715_v43, %v714_v22 }
 0x265   : > { %964 = vmatmul.bf16.gmra.mxu3 %v744_v31  ;;  %v1025_v42 = vmax.f32 %v926_v33, 0.0  ;;  %v1214_v45 = vadd.f32 %v2304_v4, %v1213_v32 }
 0x26a   : > { %v927_v53 = vpop.f32.mrf.mxu1 }
 0x26b   : > { %v928_v38 = vadd.f32 %v2217_v9, %v927_v53 }
 0x26c   : > { %v1215_v41 = vpop.f32.mrf.mxu2 }
 0x26d   : > { %v1026_v46 = vmax.f32 %v928_v38, 0.0  ;;  %v1216_v47 = vadd.f32 %v2304_v4, %v1215_v41 }
 0x26f   : > { %v1069_v51 = vpack.c.bf16 %v1026_v46, %v1025_v42  ;;  %v1707_v54 = vpack.c.bf16 %v1216_v47, %v1214_v45 }
 0x271   : > { %1819 = vst [vmem:[%s2314_s21 + $0x58] sm:$0xff] %v1707_v54   ;;  %1257 = vmatmul.bf16.gmra.mxu2 %v1069_v51 }
 0x272   : > { %v930_v55 = vpop.f32.mrf.mxu1 }
 0x273   : > { %v931_v59 = vadd.f32 %v2217_v9, %v930_v55 }
 0x274   : > { %v1218_v57 = vpop.f32.mrf.mxu2 }
 0x275   : > { %969 = vmatmul.bf16.gmra.mxu3 %v745_v56  ;;  %v1027_v1 = vmax.f32 %v931_v59, 0.0  ;;  %v1219_v2 = vadd.f32 %v2304_v4, %v1218_v57 }
 0x27a   : > { %v932_v60 = vpop.f32.mrf.mxu1 }
 0x27b   : > { %v933_v63 = vadd.f32 %v2217_v9, %v932_v60 }
 0x27c   : > { %v1220_v0 = vpop.f32.mrf.mxu2 }
 0x27d   : > { %v1028_v3 = vmax.f32 %v933_v63, 0.0  ;;  %v1221_v5 = vadd.f32 %v2304_v4, %v1220_v0 }
 0x27f   : > { %v1070_v8 = vpack.c.bf16 %v1028_v3, %v1027_v1  ;;  %v1712_v10 = vpack.c.bf16 %v1221_v5, %v1219_v2 }
 0x281   : > { %1820 = vst [vmem:[%s2314_s21 + $0x60] sm:$0xff] %v1712_v10   ;;  %1262 = vmatmul.bf16.gmra.mxu2 %v1070_v8 }
 0x282   : > { %v935_v34 = vpop.f32.mrf.mxu1 }
 0x283   : > { %v936_v13 = vadd.f32 %v2217_v9, %v935_v34 }
 0x284   : > { %v1223_v12 = vpop.f32.mrf.mxu2 }
 0x285   : > { %974 = vmatmul.bf16.gmra.mxu3 %v746_v11  ;;  %v1029_v18 = vmax.f32 %v936_v13, 0.0  ;;  %v1224_v19 = vadd.f32 %v2304_v4, %v1223_v12 }
 0x28a   : > { %v937_v14 = vpop.f32.mrf.mxu1 }
 0x28b   : > { %v938_v16 = vadd.f32 %v2217_v9, %v937_v14  ;;  %v2422_v9 = vld [vmem:[%s2534_s4] ss:$0 sm:$0xff] }
 0x28c   : > { %v1225_v17 = vpop.f32.mrf.mxu2 }
 0x28d   : > { %v1030_v20 = vmax.f32 %v938_v16, 0.0  ;;  %v1226_v21 = vadd.f32 %v2304_v4, %v1225_v17 }
 0x28f   : > { %v1071_v23 = vpack.c.bf16 %v1030_v20, %v1029_v18  ;;  %v1717_v24 = vpack.c.bf16 %v1226_v21, %v1224_v19 }
 0x291   : > { %1821 = vst [vmem:[%s2314_s21 + $0x68] sm:$0xff] %v1717_v24   ;;  %1267 = vmatmul.bf16.gmra.mxu2 %v1071_v23 }
 0x292   : > { %v940_v25 = vpop.f32.mrf.mxu1 }
 0x293   : > { %v941_v44 = vadd.f32 %v2422_v9, %v940_v25 }
 0x294   : > { %v1228_v49 = vpop.f32.mrf.mxu2 }
 0x295   : > { %979 = vmatmul.bf16.gmra.mxu3 %v747_v26  ;;  %v1031_v30 = vmax.f32 %v941_v44, 0.0  ;;  %v1229_v31 = vadd.f32 %v2304_v4, %v1228_v49 }
 0x29a   : > { %v942_v27 = vpop.f32.mrf.mxu1 }
 0x29b   : > { %v943_v29 = vadd.f32 %v2422_v9, %v942_v27 }
 0x29c   : > { %v1230_v52 = vpop.f32.mrf.mxu2 }
 0x29d   : > { %v1032_v32 = vmax.f32 %v943_v29, 0.0  ;;  %v1231_v33 = vadd.f32 %v2304_v4, %v1230_v52 }
 0x29f   : > { %v1072_v53 = vpack.c.bf16 %v1032_v32, %v1031_v30  ;;  %v1722_v35 = vpack.c.bf16 %v1231_v33, %v1229_v31 }
 0x2a1   : > { %1822 = vst [vmem:[%s2314_s21 + $0x70] sm:$0xff] %v1722_v35   ;;  %1272 = vmatmul.bf16.gmra.mxu2 %v1072_v53 }
 0x2a4   : > { %v1233_v36 = vpop.f32.mrf.mxu2 }
 0x2a5   : > { %v1234_v41 = vadd.f32 %v2304_v4, %v1233_v36 }
 0x2a8   : > { %v945_v40 = vpop.f32.mrf.mxu3 }
 0x2a9   : > { %v946_v45 = vadd.f32 %v2422_v9, %v945_v40 }
 0x2ab   : > { %v1033_v50 = vmax.f32 %v946_v45, 0.0 }
 0x2ac   : > { %v1235_v38 = vpop.f32.mrf.mxu2 }
 0x2ad   : > { %v1236_v42 = vadd.f32 %v2304_v4, %v1235_v38 }
 0x2af   : > { %v1727_v46 = vpack.c.bf16 %v1236_v42, %v1234_v41 }
 0x2b0   : > { %v947_v47 = vpop.f32.mrf.mxu3 }
 0x2b1   : > { %1823 = vst [vmem:[%s2314_s21 + $0x78] sm:$0xff] %v1727_v46   ;;  %v948_v48 = vadd.f32 %v2422_v9, %v947_v47 }
 0x2b3   : > { %v1034_v51 = vmax.f32 %v948_v48, 0.0 }
 0x2b4   : > { %v1238_v54 = vpop.f32.mrf.mxu2 }
 0x2b5   : > { %v1073_v55 = vpack.c.bf16 %v1034_v51, %v1033_v50  ;;  %v1239_v58 = vadd.f32 %v2304_v4, %v1238_v54 }
 0x2b7   : > { %1277 = vmatmul.bf16.vlgmr.msra.gmra.mxu3 %v1073_v55 }
 0x2b8   : > { %v950_v56 = vpop.f32.mrf.mxu3 }
 0x2b9   : > { %v951_v60 = vadd.f32 %v2422_v9, %v950_v56 }
 0x2bb   : > { %v1035_v0 = vmax.f32 %v951_v60, 0.0 }
 0x2bc   : > { %v1240_v57 = vpop.f32.mrf.mxu2 }
 0x2bd   : > { %v1241_v59 = vadd.f32 %v2304_v4, %v1240_v57 }
 0x2bf   : > { %v1732_v61 = vpack.c.bf16 %v1241_v59, %v1239_v58 }
 0x2c0   : > { %v952_v62 = vpop.f32.mrf.mxu3 }
 0x2c1   : > { %1824 = vst [vmem:[%s2314_s21 + $0x80] sm:$0xff] %v1732_v61   ;;  %v953_v63 = vadd.f32 %v2422_v9, %v952_v62 }
 0x2c3   : > { %v1036_v1 = vmax.f32 %v953_v63, 0.0 }
 0x2c4   : > { %v1243_v2 = vpop.f32.mrf.mxu2 }
 0x2c5   : > { %v1074_v3 = vpack.c.bf16 %v1036_v1, %v1035_v0  ;;  %v1244_v6 = vadd.f32 %v2304_v4, %v1243_v2 }
 0x2c7   : > { %1282 = vmatmul.bf16.gmra.mxu3 %v1074_v3 }
 0x2c8   : > { %v955_v5 = vpop.f32.mrf.mxu3 }
 0x2c9   : > { %v956_v8 = vadd.f32 %v2422_v9, %v955_v5 }
 0x2cb   : > { %v1037_v12 = vmax.f32 %v956_v8, 0.0 }
 0x2cc   : > { %v1245_v28 = vpop.f32.mrf.mxu2 }
 0x2cd   : > { %v1246_v7 = vadd.f32 %v2304_v4, %v1245_v28 }
 0x2cf   : > { %v1737_v10 = vpack.c.bf16 %v1246_v7, %v1244_v6 }
 0x2d0   : > { %v957_v34 = vpop.f32.mrf.mxu3 }
 0x2d1   : > { %1825 = vst [vmem:[%s2314_s21 + $0x88] sm:$0xff] %v1737_v10   ;;  %v958_v11 = vadd.f32 %v2422_v9, %v957_v34 }
 0x2d3   : > { %v1038_v37 = vmax.f32 %v958_v11, 0.0 }
 0x2d4   : > { %v1248_v13 = vpop.f32.mrf.mxu2 }
 0x2d5   : > { %v1075_v14 = vpack.c.bf16 %v1038_v37, %v1037_v12  ;;  %v1249_v16 = vadd.f32 %v2304_v4, %v1248_v13 }
 0x2d7   : > { %1287 = vmatmul.bf16.gmra.mxu3 %v1075_v14 }
 0x2d8   : > { %v960_v39 = vpop.f32.mrf.mxu3 }
 0x2d9   : > { %v961_v18 = vadd.f32 %v2422_v9, %v960_v39 }
 0x2db   : > { %v1039_v22 = vmax.f32 %v961_v18, 0.0 }
 0x2dc   : > { %v1250_v15 = vpop.f32.mrf.mxu2 }
 0x2dd   : > { %v1251_v17 = vadd.f32 %v2304_v4, %v1250_v15 }
 0x2df   : > { %v1742_v19 = vpack.c.bf16 %v1251_v17, %v1249_v16 }
 0x2e0   : > { %v962_v20 = vpop.f32.mrf.mxu3 }
 0x2e1   : > { %1826 = vst [vmem:[%s2314_s21 + $0x90] sm:$0xff] %v1742_v19   ;;  %v963_v21 = vadd.f32 %v2422_v9, %v962_v20 }
 0x2e3   : > { %v1040_v43 = vmax.f32 %v963_v21, 0.0 }
 0x2e4   : > { %v1253_v23 = vpop.f32.mrf.mxu2 }
 0x2e5   : > { %v1076_v24 = vpack.c.bf16 %v1040_v43, %v1039_v22  ;;  %v1254_v49 = vadd.f32 %v2304_v4, %v1253_v23 }
 0x2e7   : > { %1292 = vmatmul.bf16.gmra.mxu3 %v1076_v24 }
 0x2e8   : > { %v965_v25 = vpop.f32.mrf.mxu3 }
 0x2e9   : > { %v966_v27 = vadd.f32 %v2422_v9, %v965_v25 }
 0x2eb   : > { %v1041_v31 = vmax.f32 %v966_v27, 0.0 }
 0x2ec   : > { %v1255_v26 = vpop.f32.mrf.mxu2 }
 0x2ed   : > { %v1256_v44 = vadd.f32 %v2304_v4, %v1255_v26 }
 0x2ef   : > { %v1747_v29 = vpack.c.bf16 %v1256_v44, %v1254_v49 }
 0x2f0   : > { %v967_v52 = vpop.f32.mrf.mxu3 }
 0x2f1   : > { %1827 = vst [vmem:[%s2314_s21 + $0x98] sm:$0xff] %v1747_v29   ;;  %v968_v30 = vadd.f32 %v2422_v9, %v967_v52 }
 0x2f3   : > { %v1042_v32 = vmax.f32 %v968_v30, 0.0 }
 0x2f4   : > { %v1258_v33 = vpop.f32.mrf.mxu2 }
 0x2f5   : > { %v1077_v53 = vpack.c.bf16 %v1042_v32, %v1041_v31  ;;  %v1259_v40 = vadd.f32 %v2304_v4, %v1258_v33 }
 0x2f7   : > { %1297 = vmatmul.bf16.gmra.mxu3 %v1077_v53 }
 0x2f8   : > { %v970_v35 = vpop.f32.mrf.mxu3 }
 0x2f9   : > { %v971_v41 = vadd.f32 %v2422_v9, %v970_v35 }
 0x2fb   : > { %v1043_v47 = vmax.f32 %v971_v41, 0.0 }
 0x2fc   : > { %v1260_v36 = vpop.f32.mrf.mxu2 }
 0x2fd   : > { %v1261_v38 = vadd.f32 %v2304_v4, %v1260_v36 }
 0x2ff   : > { %v1752_v42 = vpack.c.bf16 %v1261_v38, %v1259_v40 }
 0x300   : > { %v972_v45 = vpop.f32.mrf.mxu3 }
 0x301   : > { %1828 = vst [vmem:[%s2314_s21 + $0xa0] sm:$0xff] %v1752_v42   ;;  %v973_v46 = vadd.f32 %v2422_v9, %v972_v45 }
 0x303   : > { %v1044_v48 = vmax.f32 %v973_v46, 0.0 }
 0x304   : > { %v1263_v50 = vpop.f32.mrf.mxu2 }
 0x305   : > { %v1078_v51 = vpack.c.bf16 %v1044_v48, %v1043_v47  ;;  %v1264_v56 = vadd.f32 %v2304_v4, %v1263_v50 }
 0x307   : > { %1302 = vmatmul.bf16.gmra.mxu3 %v1078_v51 }
 0x308   : > { %v975_v54 = vpop.f32.mrf.mxu3 }
 0x309   : > { %v976_v58 = vadd.f32 %v2422_v9, %v975_v54 }
 0x30b   : > { %v1045_v62 = vmax.f32 %v976_v58, 0.0 }
 0x30c   : > { %v1265_v55 = vpop.f32.mrf.mxu2 }
 0x30d   : > { %v1266_v57 = vadd.f32 %v2304_v4, %v1265_v55 }
 0x30f   : > { %v1757_v59 = vpack.c.bf16 %v1266_v57, %v1264_v56 }
 0x310   : > { %v977_v60 = vpop.f32.mrf.mxu3 }
 0x311   : > { %1829 = vst [vmem:[%s2314_s21 + $0xa8] sm:$0xff] %v1757_v59   ;;  %v978_v61 = vadd.f32 %v2422_v9, %v977_v60 }
 0x313   : > { %v1046_v63 = vmax.f32 %v978_v61, 0.0 }
 0x314   : > { %v1268_v0 = vpop.f32.mrf.mxu2 }
 0x315   : > { %v1079_v1 = vpack.c.bf16 %v1046_v63, %v1045_v62  ;;  %v1269_v5 = vadd.f32 %v2304_v4, %v1268_v0 }
 0x317   : > { %1307 = vmatmul.bf16.gmra.mxu3 %v1079_v1 }
 0x318   : > { %v980_v2 = vpop.f32.mrf.mxu3 }
 0x319   : > { %v981_v6 = vadd.f32 %v2422_v9, %v980_v2 }
 0x31b   : > { %v1047_v34 = vmax.f32 %v981_v6, 0.0 }
 0x31c   : > { %v1270_v3 = vpop.f32.mrf.mxu2 }
 0x31d   : > { %v1271_v28 = vadd.f32 %v2304_v4, %v1270_v3 }
 0x31f   : > { %v1762_v7 = vpack.c.bf16 %v1271_v28, %v1269_v5 }
 0x320   : > { %v982_v8 = vpop.f32.mrf.mxu3 }
 0x321   : > { %1830 = vst [vmem:[%s2314_s21 + $0xb0] sm:$0xff] %v1762_v7   ;;  %v983_v10 = vadd.f32 %v2422_v9, %v982_v8 }
 0x323   : > { %v1048_v11 = vmax.f32 %v983_v10, 0.0 }
 0x324   : > { %v1273_v12 = vpop.f32.mrf.mxu2 }
 0x325   : > { %v1080_v37 = vpack.c.bf16 %v1048_v11, %v1047_v34  ;;  %v1274_v14 = vadd.f32 %v2304_v4, %v1273_v12 }
 0x327   : > { %1312 = vmatmul.bf16.gmra.mxu3 %v1080_v37 }
 0x32c   : > { %v1275_v13 = vpop.f32.mrf.mxu2 }
 0x32d   : > { %v1276_v39 = vadd.f32 %v2304_v4, %v1275_v13 }
 0x32f   : > { %v1767_v15 = vpack.c.bf16 %v1276_v39, %v1274_v14 }
 0x331   : > { %1831 = vst [vmem:[%s2314_s21 + $0xb8] sm:$0xff] %v1767_v15  }
 0x33a   : > { %v1278_v16 = vpop.f32.mrf.mxu3 }
 0x33b   : > { %v1279_v18 = vadd.f32 %v2304_v4, %v1278_v16 }
 0x342   : > { %v1280_v17 = vpop.f32.mrf.mxu3 }
 0x343   : > { %v1281_v9 = vadd.f32 %v2304_v4, %v1280_v17 }
 0x345   : > { %v1772_v19 = vpack.c.bf16 %v1281_v9, %v1279_v18 }
 0x347   : > { %1832 = vst [vmem:[%s2314_s21 + $0xc0] sm:$0xff] %v1772_v19  }
 0x34a   : > { %v1283_v20 = vpop.f32.mrf.mxu3 }
 0x34b   : > { %v1284_v22 = vadd.f32 %v2304_v4, %v1283_v20 }
 0x352   : > { %v1285_v21 = vpop.f32.mrf.mxu3 }
 0x353   : > { %v1286_v43 = vadd.f32 %v2304_v4, %v1285_v21 }
 0x355   : > { %v1777_v23 = vpack.c.bf16 %v1286_v43, %v1284_v22 }
 0x357   : > { %1833 = vst [vmem:[%s2314_s21 + $0xc8] sm:$0xff] %v1777_v23  }
 0x35a   : > { %v1288_v24 = vpop.f32.mrf.mxu3 }
 0x35b   : > { %v1289_v26 = vadd.f32 %v2304_v4, %v1288_v24 }
 0x362   : > { %v1290_v25 = vpop.f32.mrf.mxu3 }
 0x363   : > { %v1291_v49 = vadd.f32 %v2304_v4, %v1290_v25 }
 0x365   : > { %v1782_v44 = vpack.c.bf16 %v1291_v49, %v1289_v26 }
 0x367   : > { %1834 = vst [vmem:[%s2314_s21 + $0xd0] sm:$0xff] %v1782_v44  }
 0x36a   : > { %v1293_v27 = vpop.f32.mrf.mxu3 }
 0x36b   : > { %v1294_v52 = vadd.f32 %v2304_v4, %v1293_v27 }
 0x372   : > { %v1295_v29 = vpop.f32.mrf.mxu3 }
 0x373   : > { %v1296_v30 = vadd.f32 %v2304_v4, %v1295_v29 }
 0x375   : > { %v1787_v31 = vpack.c.bf16 %v1296_v30, %v1294_v52 }
 0x377   : > { %1835 = vst [vmem:[%s2314_s21 + $0xd8] sm:$0xff] %v1787_v31  }
 0x37a   : > { %v1298_v32 = vpop.f32.mrf.mxu3 }
 0x37b   : > { %v1299_v53 = vadd.f32 %v2304_v4, %v1298_v32 }
 0x382   : > { %v1300_v33 = vpop.f32.mrf.mxu3 }
 0x383   : > { %v1301_v35 = vadd.f32 %v2304_v4, %v1300_v33 }
 0x385   : > { %v1792_v36 = vpack.c.bf16 %v1301_v35, %v1299_v53 }
 0x387   : > { %1836 = vst [vmem:[%s2314_s21 + $0xe0] sm:$0xff] %v1792_v36  }
 0x38a   : > { %v1303_v40 = vpop.f32.mrf.mxu3 }
 0x38b   : > { %v1304_v41 = vadd.f32 %v2304_v4, %v1303_v40 }
 0x392   : > { %v1305_v38 = vpop.f32.mrf.mxu3 }
 0x393   : > { %v1306_v42 = vadd.f32 %v2304_v4, %v1305_v38 }
 0x395   : > { %v1797_v45 = vpack.c.bf16 %v1306_v42, %v1304_v41 }
 0x397   : > { %1837 = vst [vmem:[%s2314_s21 + $0xe8] sm:$0xff] %v1797_v45  }
 0x39a   : > { %v1308_v46 = vpop.f32.mrf.mxu3 }
 0x39b   : > { %v1309_v48 = vadd.f32 %v2304_v4, %v1308_v46 }
 0x3a2   : > { %v1310_v47 = vpop.f32.mrf.mxu3 }
 0x3a3   : > { %v1311_v50 = vadd.f32 %v2304_v4, %v1310_v47 }
 0x3a5   : > { %v1802_v51 = vpack.c.bf16 %v1311_v50, %v1309_v48 }
 0x3a7   : > { %1838 = vst [vmem:[%s2314_s21 + $0xf0] sm:$0xff] %v1802_v51  }
 0x3aa   : > { %v1313_v54 = vpop.f32.mrf.mxu3 }
 0x3ab   : > { %v1314_v56 = vadd.f32 %v2304_v4, %v1313_v54 }
 0x3b2   : > { %v1315_v55 = vpop.f32.mrf.mxu3 }
 0x3b3   : > { %v1316_v57 = vadd.f32 %v2304_v4, %v1315_v55 }
 0x3b5   : > { %v1807_v58 = vpack.c.bf16 %v1316_v57, %v1314_v56 }
 0x3b7   : > { %1839 = vst [vmem:[%s2314_s21 + $0xf8] sm:$0xff] %v1807_v58  }
 0x3b8   : > { %1930 = shalt.err (!%p1927_p3)
}
 0x3b9   : > { %s1967_s16 = smov 64   ;;  %s1968_s21 = smov 4  }
 0x3ba   : > { %1857 = dma.vmem_to_hbm [thread:$0]  (%p2047_p5), %s1460_s15, 4096, %s1462_s17, %s1447_s18, %s1967_s16, %s1967_s16, %s1968_s21  }
 0x3bb PF: > { %p1863_p4 = scmp.ge.s32.totalorder %s1965_s27, 2  ;;  %s1476_s9 = sand.u32 1, %s1953_s24  }
 0x3bc   : > { %s1477_s13 = scalar_lea.sflag [#allocation3], %s1476_s9 }
 0x3bd   : > { %p1860_p7 = pnand %p1863_p4, %p2051_p6 }
 0x3bf   : > { %p1861_p8 = pneg %p1860_p7 }
 0x3c1   : > { %1948 = dma.done.wait (%p1861_p8), %s1477_s13, 4096  }
 0x3c2   : > { %1950 = vsyncadd (%p1861_p8), %s1477_s13, 4294963200  ;;  %p17_p9 = scmp.ge.s32.totalorder %s2034_s30, 4   ;;  %s2540_s24 = smov %s1957_s25 }
 0x3c3   : > { %s2541_s25 = smov %s1961_s26  ;;  %s2542_s26 = smov %s2045_s10 }
 0x3c4   : > { %s2543_s27 = smov %s2034_s30  ;;  %19 = sbr.rel (!%p17_p9) target bundleno = 3 (0x3), region = 83 }
 0x3c9   :  { %1483 = vsyncpa [#allocation3], 1 }
 0x3ca   :  { %1485 = vsyncpa [#allocation3 + $0x1], 1 }

</bundles_post_ra>
